<compile_context>
chip_gen: v7x
topology: tpu7x:2x2x1
jax: 0.10.0
libtpu: 0.0.40
codegen_flags: <defaults>
</compile_context>

<pallas_src>
import jax
import jax.numpy as jnp
import numpy as np
from jax.experimental import pallas as pl

# ---- Problem sizes (consistent with GATActor.__init__) ----
B = 2              # num_graphs
N = 8              # nodes per graph (>= num_agents)
A = 5              # num_agents
FIN = 4            # in_channels
HID = 8            # hidden_channels
H = 8              # attention heads
C = HID            # per-head channels
HC = H * C         # 64  = concat output width of each GATConv
BN = B * N         # 16  = all nodes, batch folded into sublanes
BNH = BN * H       # 128 = lane-major (source node, head) axis
F1_IN = HID * 16   # 128 (agent emb 64 + graph emb 64)
F1_OUT = HID * 4   # 32
ADIM = 3           # action_dim
OUT_PAD = 128      # lane-dense padded output width
ROW_PAD = 16       # sublane-padded head rows (>= B*A)


# ----------------------------------------------------------------------------
# Fused kernel (single grid step): self-loop prep -> conv1 -> conv2 -> conv3
# -> pool / agent-extract / fc1 / fc2.  Everything stays in VMEM.
# ----------------------------------------------------------------------------
def fused_actor_kernel(
    x_ref, adj_ref, ea_ref,
    eye_ref, rexp_ref, reph_ref, hmask_ref, dsum_ref, sela_ref, pool_ref,
    w1_ref, de1_ref, as1_ref, ec1_ref, b1_ref,
    w2_ref, de2_ref, as2_ref, ec2_ref, b2_ref,
    w3_ref, de3_ref, as3_ref, ec3_ref, b3_ref,
    wfa_ref, wfg_ref, bf1_ref, wf2_ref, bf2_ref,
    out_ref,
):
    f32 = jnp.float32
    dot = lambda a, b: jnp.dot(a, b, preferred_element_type=f32)

    adj = adj_ref[...]      # (BN, BN) block-diagonal: adj[i, j] = edge j -> i
    ea = ea_ref[...]        # (BN, BN) scalar edge attrs
    eye = eye_ref[...]      # (BN, BN) identity (host constant)
    rexp = rexp_ref[...]    # (BN, BNH)   rexp[g, g'*H+h] = (g == g')
    reph = reph_ref[...]    # (BNH, BN)   reph[g*H+h, g'] = (g == g')
    hmask = hmask_ref[...]  # (BNH, HC)   hmask[g*H+h, h'*C+c] = (h == h')
    dsum = dsum_ref[...]    # (BNH, BNH)  dsum[g*H+h, g'*H+h'] = (h == h')

    # PyG add_self_loops(fill_value='mean') for conv2/conv3 (conv1 has
    # add_self_loops=False): self-loop edge attr = mean of incoming edge attrs.
    adj_nl = adj * (1.0 - eye)
    deg = jnp.sum(adj_nl, axis=-1, keepdims=True)
    esum = jnp.sum(ea * adj_nl, axis=-1, keepdims=True)
    loop_val = esum / jnp.maximum(deg, 1.0)                    # exact division
    adj_sl = adj_nl + eye
    ea_sl = ea * (1.0 - eye) + loop_val * eye

    # Lane-expand adjacency / edge attrs once to the (BN, BN*H) attention layout.
    adj1_big = dot(adj, rexp)
    ea1_big = dot(ea, rexp)
    adj2_big = dot(adj_sl, rexp)
    ea2_big = dot(ea_sl, rexp)

    def gat(xin, w_ref, dexp_ref, asrc_ref, ecoef_ref, bias_ref, a_big, e_big):
        # Shared linear (lin_src == lin_dst in PyG GATConv).
        h = dot(xin, w_ref[...])                                # (BN, HC)
        # Head-masked source-feature matrix: h_big[g*H+h, h'*C+c] = h[g,:]*(h==h')
        h_big = dot(reph, h) * hmask                            # (BNH, HC)
        # att_dst term per target row, already tiled over the (source, head) lanes.
        dst_big = dot(h, dexp_ref[...])                         # (BN, BNH)
        # att_src term per (source, head) lane: one transposed-RHS dot_general.
        src_row = jax.lax.dot_general(
            asrc_ref[...], h_big, (((1,), (1,)), ((), ())),
            preferred_element_type=f32)                         # (1, BNH)
        # sc[i, g*H+h] = a_dst[i,h] + a_src[g,h] + ea[i,g] * ecoef[h]
        sc = dst_big + src_row + e_big * ecoef_ref[...]
        sc = jnp.where(sc > 0, sc, 0.2 * sc)                    # LeakyReLU(0.2)
        sc = jnp.where(a_big > 0, sc, -1e30)                    # mask non-edges
        m = jnp.max(sc, axis=-1, keepdims=True)                 # one row max (exact per head)
        p = jnp.exp(sc - m) * a_big
        denom = jnp.maximum(dot(p, dsum), 1e-20)                # per-head softmax denominators
        alpha = p / denom                                       # exact reciprocal path
        out = dot(alpha, h_big)                                 # multi-head aggregation + concat
        return jnp.maximum(out + bias_ref[...], 0.0)            # conv bias + fused torch.relu

    x1 = gat(x_ref[...], w1_ref, de1_ref, as1_ref, ec1_ref, b1_ref, adj1_big, ea1_big)
    x2 = gat(x1, w2_ref, de2_ref, as2_ref, ec2_ref, b2_ref, adj2_big, ea2_big)
    x3 = gat(x2, w3_ref, de3_ref, as3_ref, ec3_ref, b3_ref, adj2_big, ea2_big)

    # Actor head: agent extraction + global_mean_pool as selector matmuls, and the
    # [agents | graph] concat folded into the split fc1 weight (no concatenate).
    agents = dot(sela_ref[...], x3)                             # (ROW_PAD, HC)
    g_rep = dot(pool_ref[...], x3)                              # (ROW_PAD, HC)
    h1 = jnp.maximum(
        dot(agents, wfa_ref[...]) + dot(g_rep, wfg_ref[...]) + bf1_ref[...], 0.0)
    out_ref[...] = dot(h1, wf2_ref[...]) + bf2_ref[...]         # lane-dense (ROW_PAD, 128)


# ----------------------------------------------------------------------------
# Host-side constants / layout plumbing.
# ----------------------------------------------------------------------------
def _build_static_constants():
    col_h = np.arange(BNH) % H
    col_g = np.arange(BNH) // H
    eye16 = np.eye(BN, dtype=np.float32)
    rexp = (np.arange(BN)[:, None] == col_g[None, :]).astype(np.float32)       # (BN, BNH)
    reph = np.ascontiguousarray(rexp.T)                                        # (BNH, BN)
    hmask = (col_h[:, None] == (np.arange(HC) // C)[None, :]).astype(np.float32)  # (BNH, HC)
    dsum = (col_h[:, None] == col_h[None, :]).astype(np.float32)               # (BNH, BNH)
    sela = np.zeros((ROW_PAD, BN), np.float32)    # first A nodes of each graph
    pool = np.zeros((ROW_PAD, BN), np.float32)    # per-graph mean pool, repeated per agent
    for b in range(B):
        for a_idx in range(A):
            sela[b * A + a_idx, b * N + a_idx] = 1.0
        pool[b * A:(b + 1) * A, b * N:(b + 1) * N] = 1.0 / N
    return tuple(jnp.asarray(v) for v in (eye16, rexp, reph, hmask, dsum, sela, pool))


def _block_diag(m):
    """(B, N, N) per-graph matrices -> (B*N, B*N) block-diagonal."""
    out = jnp.zeros((BN, BN), m.dtype)
    for b in range(B):
        out = out.at[b * N:(b + 1) * N, b * N:(b + 1) * N].set(m[b])
    return out


def init_gat_raw(key, fin):
    """Synthetic raw GATConv(fin -> HID, heads=H, concat=True, edge_dim=1) params."""
    ks = jax.random.split(key, 5)
    s = 0.2
    return dict(
        w=jax.random.normal(ks[0], (fin, HC), jnp.float32) * s,        # lin.weight^T
        att_src=jax.random.normal(ks[1], (H, C), jnp.float32) * s,
        att_dst=jax.random.normal(ks[2], (H, C), jnp.float32) * s,
        w_edge=jax.random.normal(ks[3], (H, C), jnp.float32) * s,      # lin_edge (1 -> H*C)
        att_edge=jax.random.normal(ks[4], (H, C), jnp.float32) * s,
        bias=jnp.zeros((1, HC), jnp.float32),
    )


def kernel_layer_inputs(raw):
    """Derive the lane-major helper operands the fused kernel consumes."""
    att_src = np.asarray(raw["att_src"])
    att_dst = np.asarray(raw["att_dst"])
    ecoef = np.sum(np.asarray(raw["w_edge"]) * np.asarray(raw["att_edge"]), axis=-1)  # (H,)
    col_h = np.arange(BNH) % H
    # (x @ W) @ dst_exp yields the att_dst term laid out over the (source, head) lanes.
    dst_exp = np.zeros((HC, BNH), np.float32)
    for h in range(H):
        for c in range(C):
            dst_exp[h * C + c, col_h == h] = att_dst[h, c]
    asrc_flat = att_src.reshape(1, HC).astype(np.float32)       # [0, h*C+c] = att_src[h, c]
    ecoef_row = ecoef[col_h].reshape(1, BNH).astype(np.float32)  # [0, g*H+h] = ecoef[h]
    return (raw["w"], jnp.asarray(dst_exp), jnp.asarray(asrc_flat),
            jnp.asarray(ecoef_row), raw["bias"])


def gat_actor_forward(x, adj, ea, p1, p2, p3, wf1, bf1, wf2, bf2):
    # Layout plumbing only: fold batch into sublanes, block-diagonal graphs.
    x_all = x.reshape(BN, FIN)
    adj_full = _block_diag(adj)
    ea_full = _block_diag(ea)
    consts = _build_static_constants()

    wf1_agent = wf1[:HC]            # acts on agent embeddings (concat folded into fc1)
    wf1_graph = wf1[HC:]            # acts on the pooled graph embedding
    wf2_pad = jnp.zeros((F1_OUT, OUT_PAD), jnp.float32).at[:, :ADIM].set(wf2)
    bf2_pad = jnp.zeros((1, OUT_PAD), jnp.float32).at[:, :ADIM].set(bf2)

    inputs = [x_all, adj_full, ea_full, *consts, *p1, *p2, *p3,
              wf1_agent, wf1_graph, bf1, wf2_pad, bf2_pad]

    out = pl.pallas_call(
        fused_actor_kernel,
        out_shape=jax.ShapeDtypeStruct((ROW_PAD, OUT_PAD), jnp.float32),
        grid=(1,),
        in_specs=[pl.BlockSpec(arr.shape, lambda i: (0, 0)) for arr in inputs],
        out_specs=pl.BlockSpec((ROW_PAD, OUT_PAD), lambda i: (0, 0)),
    )(*inputs)
    return out[:B * A, :ADIM].reshape(B, A, ADIM)


# ----------------------------------------------------------------------------
# Pure-JAX reference (mirrors the PyTorch module) for a correctness check.
# ----------------------------------------------------------------------------
def reference_forward(x, adj, ea, raw1, raw2, raw3, wf1, bf1, wf2, bf2):
    def gat_layer(xg, adj_g, ea_g, prm, add_self_loops):
        if add_self_loops:
            eye = jnp.eye(N, dtype=xg.dtype)
            adj_nl = adj_g * (1.0 - eye)
            deg = jnp.sum(adj_nl, axis=-1, keepdims=True)
            loop = jnp.sum(ea_g * adj_nl, axis=-1, keepdims=True) / jnp.maximum(deg, 1.0)
            adj_g = adj_nl + eye
            ea_g = ea_g * (1.0 - eye) + loop * eye
        h = xg @ prm["w"]
        hh = h.reshape(N, H, C)
        a_src = jnp.sum(hh * prm["att_src"][None], axis=-1)
        a_dst = jnp.sum(hh * prm["att_dst"][None], axis=-1)
        ecoef = jnp.sum(prm["w_edge"] * prm["att_edge"], axis=-1)
        sc = (a_dst[:, None, :] + a_src[None, :, :]
              + ea_g[:, :, None] * ecoef[None, None, :])        # (tgt, src, head)
        sc = jnp.where(sc > 0, sc, 0.2 * sc)
        mask = adj_g[:, :, None] > 0
        sc = jnp.where(mask, sc, -jnp.inf)
        alpha = jax.nn.softmax(sc, axis=1)
        alpha = jnp.where(mask, alpha, 0.0)
        out = jnp.einsum("ijh,jhc->ihc", alpha, hh).reshape(N, HC) + prm["bias"]
        return jnp.maximum(out, 0.0)

    means = []
    for b in range(B):
        x1 = gat_layer(x[b], adj[b], ea[b], raw1, False)
        x2 = gat_layer(x1, adj[b], ea[b], raw2, True)
        x3 = gat_layer(x2, adj[b], ea[b], raw3, True)
        g_emb = jnp.mean(x3, axis=0, keepdims=True)
        comb = jnp.concatenate([x3[:A], jnp.broadcast_to(g_emb, (A, HC))], axis=1)
        h1 = jnp.maximum(comb @ wf1 + bf1, 0.0)
        means.append(h1 @ wf2 + bf2)
    return jnp.stack(means, axis=0)


if __name__ == "__main__":
    key = jax.random.PRNGKey(0)
    kx, ke, k1, k2, k3, kf1, kf2 = jax.random.split(key, 7)

    # Dense graph data: fully connected graphs, no self loops, scalar edge attrs.
    x0 = jax.random.normal(kx, (B, N, FIN), jnp.float32)
    eye_n = jnp.eye(N, dtype=jnp.float32)[None]
    adj = jnp.ones((B, N, N), jnp.float32) * (1.0 - eye_n)
    ea = jax.random.uniform(ke, (B, N, N), jnp.float32) * adj

    # Deterministic synthetic parameters.
    raw1 = init_gat_raw(k1, FIN)
    raw2 = init_gat_raw(k2, HC)
    raw3 = init_gat_raw(k3, HC)
    p1 = kernel_layer_inputs(raw1)
    p2 = kernel_layer_inputs(raw2)
    p3 = kernel_layer_inputs(raw3)
    wf1 = jax.random.normal(kf1, (F1_IN, F1_OUT), jnp.float32) * 0.1
    bf1 = jnp.zeros((1, F1_OUT), jnp.float32)
    wf2 = jax.random.normal(kf2, (F1_OUT, ADIM), jnp.float32) * 0.1
    bf2 = jnp.zeros((1, ADIM), jnp.float32)
    log_std = jnp.full((1, 1, ADIM), -2.2, jnp.float32)

    # Fused forward pass (single pallas_call, single grid step).
    action_mean = gat_actor_forward(x0, adj, ea, p1, p2, p3, wf1, bf1, wf2, bf2)
    action_std = jnp.broadcast_to(jnp.exp(log_std), action_mean.shape)
    jax.block_until_ready((action_mean, action_std))

    # Correctness check against the plain-JAX reference of the module.
    ref_mean = reference_forward(x0, adj, ea, raw1, raw2, raw3, wf1, bf1, wf2, bf2)
    assert action_mean.shape == (B, A, ADIM)
    assert action_std.shape == (B, A, ADIM)
    assert bool(jnp.all(jnp.isfinite(action_mean)))
    assert bool(jnp.max(jnp.abs(action_mean - ref_mean)) < 1e-2)
    print("KERNEL_OK")
</pallas_src>

<mosaic_0001>
module attributes {stable_mosaic.version = 11 : i64} {
  func.func @fused_actor_kernel(%arg0: i32, %arg1: memref<16x4xf32, #tpu.memory_space<vmem>>, %arg2: memref<16x16xf32, #tpu.memory_space<vmem>>, %arg3: memref<16x16xf32, #tpu.memory_space<vmem>>, %arg4: memref<16x16xf32, #tpu.memory_space<vmem>>, %arg5: memref<16x128xf32, #tpu.memory_space<vmem>>, %arg6: memref<128x16xf32, #tpu.memory_space<vmem>>, %arg7: memref<128x64xf32, #tpu.memory_space<vmem>>, %arg8: memref<128x128xf32, #tpu.memory_space<vmem>>, %arg9: memref<16x16xf32, #tpu.memory_space<vmem>>, %arg10: memref<16x16xf32, #tpu.memory_space<vmem>>, %arg11: memref<4x64xf32, #tpu.memory_space<vmem>>, %arg12: memref<64x128xf32, #tpu.memory_space<vmem>>, %arg13: memref<1x64xf32, #tpu.memory_space<vmem>>, %arg14: memref<1x128xf32, #tpu.memory_space<vmem>>, %arg15: memref<1x64xf32, #tpu.memory_space<vmem>>, %arg16: memref<64x64xf32, #tpu.memory_space<vmem>>, %arg17: memref<64x128xf32, #tpu.memory_space<vmem>>, %arg18: memref<1x64xf32, #tpu.memory_space<vmem>>, %arg19: memref<1x128xf32, #tpu.memory_space<vmem>>, %arg20: memref<1x64xf32, #tpu.memory_space<vmem>>, %arg21: memref<64x64xf32, #tpu.memory_space<vmem>>, %arg22: memref<64x128xf32, #tpu.memory_space<vmem>>, %arg23: memref<1x64xf32, #tpu.memory_space<vmem>>, %arg24: memref<1x128xf32, #tpu.memory_space<vmem>>, %arg25: memref<1x64xf32, #tpu.memory_space<vmem>>, %arg26: memref<64x32xf32, #tpu.memory_space<vmem>>, %arg27: memref<64x32xf32, #tpu.memory_space<vmem>>, %arg28: memref<1x32xf32, #tpu.memory_space<vmem>>, %arg29: memref<32x128xf32, #tpu.memory_space<vmem>>, %arg30: memref<1x128xf32, #tpu.memory_space<vmem>>, %arg31: memref<16x128xf32, #tpu.memory_space<vmem>>) attributes {dimension_semantics = [#tpu.dimension_semantics<arbitrary>], iteration_bounds = array<i64: 1>, scalar_prefetch = 0 : i64, scratch_operands = 0 : i64, tpu.core_type = #tpu.core_type<tc>, window_params = [{pipeline_mode = #tpu.pipeline_mode<synchronous>, transform_indices = @transform_0, window_bounds = array<i64: 16, 4>}, {pipeline_mode = #tpu.pipeline_mode<synchronous>, transform_indices = @transform_1, window_bounds = array<i64: 16, 16>}, {pipeline_mode = #tpu.pipeline_mode<synchronous>, transform_indices = @transform_2, window_bounds = array<i64: 16, 16>}, {pipeline_mode = #tpu.pipeline_mode<synchronous>, transform_indices = @transform_3, window_bounds = array<i64: 16, 16>}, {pipeline_mode = #tpu.pipeline_mode<synchronous>, transform_indices = @transform_4, window_bounds = array<i64: 16, 128>}, {pipeline_mode = #tpu.pipeline_mode<synchronous>, transform_indices = @transform_5, window_bounds = array<i64: 128, 16>}, {pipeline_mode = #tpu.pipeline_mode<synchronous>, transform_indices = @transform_6, window_bounds = array<i64: 128, 64>}, {pipeline_mode = #tpu.pipeline_mode<synchronous>, transform_indices = @transform_7, window_bounds = array<i64: 128, 128>}, {pipeline_mode = #tpu.pipeline_mode<synchronous>, transform_indices = @transform_8, window_bounds = array<i64: 16, 16>}, {pipeline_mode = #tpu.pipeline_mode<synchronous>, transform_indices = @transform_9, window_bounds = array<i64: 16, 16>}, {pipeline_mode = #tpu.pipeline_mode<synchronous>, transform_indices = @transform_10, window_bounds = array<i64: 4, 64>}, {pipeline_mode = #tpu.pipeline_mode<synchronous>, transform_indices = @transform_11, window_bounds = array<i64: 64, 128>}, {pipeline_mode = #tpu.pipeline_mode<synchronous>, transform_indices = @transform_12, window_bounds = array<i64: 1, 64>}, {pipeline_mode = #tpu.pipeline_mode<synchronous>, transform_indices = @transform_13, window_bounds = array<i64: 1, 128>}, {pipeline_mode = #tpu.pipeline_mode<synchronous>, transform_indices = @transform_14, window_bounds = array<i64: 1, 64>}, {pipeline_mode = #tpu.pipeline_mode<synchronous>, transform_indices = @transform_15, window_bounds = array<i64: 64, 64>}, {pipeline_mode = #tpu.pipeline_mode<synchronous>, transform_indices = @transform_16, window_bounds = array<i64: 64, 128>}, {pipeline_mode = #tpu.pipeline_mode<synchronous>, transform_indices = @transform_17, window_bounds = array<i64: 1, 64>}, {pipeline_mode = #tpu.pipeline_mode<synchronous>, transform_indices = @transform_18, window_bounds = array<i64: 1, 128>}, {pipeline_mode = #tpu.pipeline_mode<synchronous>, transform_indices = @transform_19, window_bounds = array<i64: 1, 64>}, {pipeline_mode = #tpu.pipeline_mode<synchronous>, transform_indices = @transform_20, window_bounds = array<i64: 64, 64>}, {pipeline_mode = #tpu.pipeline_mode<synchronous>, transform_indices = @transform_21, window_bounds = array<i64: 64, 128>}, {pipeline_mode = #tpu.pipeline_mode<synchronous>, transform_indices = @transform_22, window_bounds = array<i64: 1, 64>}, {pipeline_mode = #tpu.pipeline_mode<synchronous>, transform_indices = @transform_23, window_bounds = array<i64: 1, 128>}, {pipeline_mode = #tpu.pipeline_mode<synchronous>, transform_indices = @transform_24, window_bounds = array<i64: 1, 64>}, {pipeline_mode = #tpu.pipeline_mode<synchronous>, transform_indices = @transform_25, window_bounds = array<i64: 64, 32>}, {pipeline_mode = #tpu.pipeline_mode<synchronous>, transform_indices = @transform_26, window_bounds = array<i64: 64, 32>}, {pipeline_mode = #tpu.pipeline_mode<synchronous>, transform_indices = @transform_27, window_bounds = array<i64: 1, 32>}, {pipeline_mode = #tpu.pipeline_mode<synchronous>, transform_indices = @transform_28, window_bounds = array<i64: 32, 128>}, {pipeline_mode = #tpu.pipeline_mode<synchronous>, transform_indices = @transform_29, window_bounds = array<i64: 1, 128>}, {pipeline_mode = #tpu.pipeline_mode<synchronous>, transform_indices = @transform_30, window_bounds = array<i64: 16, 128>}]} {
    %c0 = arith.constant 0 : index
    %c0_0 = arith.constant 0 : index
    %0 = vector.load %arg2[%c0, %c0_0] : memref<16x16xf32, #tpu.memory_space<vmem>>, vector<16x16xf32>
    %c0_1 = arith.constant 0 : index
    %c0_2 = arith.constant 0 : index
    %1 = vector.load %arg3[%c0_1, %c0_2] : memref<16x16xf32, #tpu.memory_space<vmem>>, vector<16x16xf32>
    %c0_3 = arith.constant 0 : index
    %c0_4 = arith.constant 0 : index
    %2 = vector.load %arg4[%c0_3, %c0_4] : memref<16x16xf32, #tpu.memory_space<vmem>>, vector<16x16xf32>
    %c0_5 = arith.constant 0 : index
    %c0_6 = arith.constant 0 : index
    %3 = vector.load %arg5[%c0_5, %c0_6] : memref<16x128xf32, #tpu.memory_space<vmem>>, vector<16x128xf32>
    %c0_7 = arith.constant 0 : index
    %c0_8 = arith.constant 0 : index
    %4 = vector.load %arg6[%c0_7, %c0_8] : memref<128x16xf32, #tpu.memory_space<vmem>>, vector<128x16xf32>
    %c0_9 = arith.constant 0 : index
    %c0_10 = arith.constant 0 : index
    %5 = vector.load %arg7[%c0_9, %c0_10] : memref<128x64xf32, #tpu.memory_space<vmem>>, vector<128x64xf32>
    %c0_11 = arith.constant 0 : index
    %c0_12 = arith.constant 0 : index
    %6 = vector.load %arg8[%c0_11, %c0_12] : memref<128x128xf32, #tpu.memory_space<vmem>>, vector<128x128xf32>
    %cst = arith.constant 1.000000e+00 : f32
    %7 = vector.broadcast %cst : f32 to vector<16x16xf32>
    %8 = arith.subf %7, %2 : vector<16x16xf32>
    %9 = arith.mulf %0, %8 : vector<16x16xf32>
    %cst_13 = arith.constant dense<0.000000e+00> : vector<16xf32>
    %10 = vector.multi_reduction <add>, %9, %cst_13 [1] : vector<16x16xf32> to vector<16xf32>
    %11 = vector.shape_cast %10 : vector<16xf32> to vector<16x1xf32>
    %12 = arith.mulf %1, %9 : vector<16x16xf32>
    %cst_14 = arith.constant dense<0.000000e+00> : vector<16xf32>
    %13 = vector.multi_reduction <add>, %12, %cst_14 [1] : vector<16x16xf32> to vector<16xf32>
    %14 = vector.shape_cast %13 : vector<16xf32> to vector<16x1xf32>
    %cst_15 = arith.constant 1.000000e+00 : f32
    %15 = vector.broadcast %cst_15 : f32 to vector<16x1xf32>
    %16 = arith.maximumf %11, %15 : vector<16x1xf32>
    %17 = arith.divf %14, %16 : vector<16x1xf32>
    %18 = arith.addf %9, %2 : vector<16x16xf32>
    %cst_16 = arith.constant 1.000000e+00 : f32
    %19 = vector.broadcast %cst_16 : f32 to vector<16x16xf32>
    %20 = arith.subf %19, %2 : vector<16x16xf32>
    %21 = arith.mulf %1, %20 : vector<16x16xf32>
    %22 = vector.broadcast %17 : vector<16x1xf32> to vector<16x16xf32>
    %23 = arith.mulf %22, %2 : vector<16x16xf32>
    %24 = arith.addf %21, %23 : vector<16x16xf32>
    %cst_17 = arith.constant dense<0.000000e+00> : vector<16x128xf32>
    %25 = tpu.matmul %0, %3, %cst_17 {dimension_numbers = #tpu.dot_dimension_numbers<[1], [0], [0], [1], [0, 0, 1, 1], [], []>} : vector<16x16xf32>, vector<16x128xf32>, vector<16x128xf32> -> vector<16x128xf32>
    %cst_18 = arith.constant dense<0.000000e+00> : vector<16x128xf32>
    %26 = tpu.matmul %1, %3, %cst_18 {dimension_numbers = #tpu.dot_dimension_numbers<[1], [0], [0], [1], [0, 0, 1, 1], [], []>} : vector<16x16xf32>, vector<16x128xf32>, vector<16x128xf32> -> vector<16x128xf32>
    %cst_19 = arith.constant dense<0.000000e+00> : vector<16x128xf32>
    %27 = tpu.matmul %18, %3, %cst_19 {dimension_numbers = #tpu.dot_dimension_numbers<[1], [0], [0], [1], [0, 0, 1, 1], [], []>} : vector<16x16xf32>, vector<16x128xf32>, vector<16x128xf32> -> vector<16x128xf32>
    %cst_20 = arith.constant dense<0.000000e+00> : vector<16x128xf32>
    %28 = tpu.matmul %24, %3, %cst_20 {dimension_numbers = #tpu.dot_dimension_numbers<[1], [0], [0], [1], [0, 0, 1, 1], [], []>} : vector<16x16xf32>, vector<16x128xf32>, vector<16x128xf32> -> vector<16x128xf32>
    %c0_21 = arith.constant 0 : index
    %c0_22 = arith.constant 0 : index
    %29 = vector.load %arg1[%c0_21, %c0_22] : memref<16x4xf32, #tpu.memory_space<vmem>>, vector<16x4xf32>
    %c0_23 = arith.constant 0 : index
    %c0_24 = arith.constant 0 : index
    %30 = vector.load %arg11[%c0_23, %c0_24] : memref<4x64xf32, #tpu.memory_space<vmem>>, vector<4x64xf32>
    %cst_25 = arith.constant dense<0.000000e+00> : vector<16x64xf32>
    %31 = tpu.matmul %29, %30, %cst_25 {dimension_numbers = #tpu.dot_dimension_numbers<[1], [0], [0], [1], [0, 0, 1, 1], [], []>} : vector<16x4xf32>, vector<4x64xf32>, vector<16x64xf32> -> vector<16x64xf32>
    %cst_26 = arith.constant dense<0.000000e+00> : vector<128x64xf32>
    %32 = tpu.matmul %4, %31, %cst_26 {dimension_numbers = #tpu.dot_dimension_numbers<[1], [0], [0], [1], [0, 0, 1, 1], [], []>} : vector<128x16xf32>, vector<16x64xf32>, vector<128x64xf32> -> vector<128x64xf32>
    %33 = arith.mulf %32, %5 : vector<128x64xf32>
    %c0_27 = arith.constant 0 : index
    %c0_28 = arith.constant 0 : index
    %34 = vector.load %arg12[%c0_27, %c0_28] : memref<64x128xf32, #tpu.memory_space<vmem>>, vector<64x128xf32>
    %cst_29 = arith.constant dense<0.000000e+00> : vector<16x128xf32>
    %35 = tpu.matmul %31, %34, %cst_29 {dimension_numbers = #tpu.dot_dimension_numbers<[1], [0], [0], [1], [0, 0, 1, 1], [], []>} : vector<16x64xf32>, vector<64x128xf32>, vector<16x128xf32> -> vector<16x128xf32>
    %c0_30 = arith.constant 0 : index
    %c0_31 = arith.constant 0 : index
    %36 = vector.load %arg13[%c0_30, %c0_31] : memref<1x64xf32, #tpu.memory_space<vmem>>, vector<1x64xf32>
    %cst_32 = arith.constant dense<0.000000e+00> : vector<1x128xf32>
    %37 = tpu.matmul %36, %33, %cst_32 {dimension_numbers = #tpu.dot_dimension_numbers<[1], [1], [0], [0], [0, 0, 1, 0], [], []>} : vector<1x64xf32>, vector<128x64xf32>, vector<1x128xf32> -> vector<1x128xf32>
    %38 = vector.broadcast %37 : vector<1x128xf32> to vector<16x128xf32>
    %39 = arith.addf %35, %38 : vector<16x128xf32>
    %c0_33 = arith.constant 0 : index
    %c0_34 = arith.constant 0 : index
    %40 = vector.load %arg14[%c0_33, %c0_34] : memref<1x128xf32, #tpu.memory_space<vmem>>, vector<1x128xf32>
    %41 = vector.broadcast %40 : vector<1x128xf32> to vector<16x128xf32>
    %42 = arith.mulf %26, %41 : vector<16x128xf32>
    %43 = arith.addf %39, %42 : vector<16x128xf32>
    %cst_35 = arith.constant 0.000000e+00 : f32
    %44 = vector.broadcast %cst_35 : f32 to vector<16x128xf32>
    %45 = arith.cmpf ogt, %43, %44 : vector<16x128xf32>
    %cst_36 = arith.constant 2.000000e-01 : f32
    %46 = vector.broadcast %cst_36 : f32 to vector<16x128xf32>
    %47 = arith.mulf %46, %43 : vector<16x128xf32>
    %48 = arith.select %45, %43, %47 : vector<16x128xi1>, vector<16x128xf32>
    %cst_37 = arith.constant 0.000000e+00 : f32
    %49 = vector.broadcast %cst_37 : f32 to vector<16x128xf32>
    %50 = arith.cmpf ogt, %25, %49 : vector<16x128xf32>
    %cst_38 = arith.constant -1.000000e+30 : f32
    %51 = vector.broadcast %cst_38 : f32 to vector<16x128xf32>
    %52 = arith.select %50, %48, %51 : vector<16x128xi1>, vector<16x128xf32>
    %cst_39 = arith.constant dense<0xFF800000> : vector<16xf32>
    %53 = vector.multi_reduction <maximumf>, %52, %cst_39 [1] : vector<16x128xf32> to vector<16xf32>
    %54 = vector.shape_cast %53 : vector<16xf32> to vector<16x1xf32>
    %55 = vector.broadcast %54 : vector<16x1xf32> to vector<16x128xf32>
    %56 = arith.subf %52, %55 : vector<16x128xf32>
    %57 = math.exp %56 : vector<16x128xf32>
    %58 = arith.mulf %57, %25 : vector<16x128xf32>
    %cst_40 = arith.constant dense<0.000000e+00> : vector<16x128xf32>
    %59 = tpu.matmul %58, %6, %cst_40 {dimension_numbers = #tpu.dot_dimension_numbers<[1], [0], [0], [1], [0, 0, 1, 1], [], []>} : vector<16x128xf32>, vector<128x128xf32>, vector<16x128xf32> -> vector<16x128xf32>
    %cst_41 = arith.constant 9.99999968E-21 : f32
    %60 = vector.broadcast %cst_41 : f32 to vector<16x128xf32>
    %61 = arith.maximumf %59, %60 : vector<16x128xf32>
    %62 = arith.divf %58, %61 : vector<16x128xf32>
    %cst_42 = arith.constant dense<0.000000e+00> : vector<16x64xf32>
    %63 = tpu.matmul %62, %33, %cst_42 {dimension_numbers = #tpu.dot_dimension_numbers<[1], [0], [0], [1], [0, 0, 1, 1], [], []>} : vector<16x128xf32>, vector<128x64xf32>, vector<16x64xf32> -> vector<16x64xf32>
    %c0_43 = arith.constant 0 : index
    %c0_44 = arith.constant 0 : index
    %64 = vector.load %arg15[%c0_43, %c0_44] : memref<1x64xf32, #tpu.memory_space<vmem>>, vector<1x64xf32>
    %65 = vector.broadcast %64 : vector<1x64xf32> to vector<16x64xf32>
    %66 = arith.addf %63, %65 : vector<16x64xf32>
    %cst_45 = arith.constant 0.000000e+00 : f32
    %67 = vector.broadcast %cst_45 : f32 to vector<16x64xf32>
    %68 = arith.maximumf %66, %67 : vector<16x64xf32>
    %c0_46 = arith.constant 0 : index
    %c0_47 = arith.constant 0 : index
    %69 = vector.load %arg16[%c0_46, %c0_47] : memref<64x64xf32, #tpu.memory_space<vmem>>, vector<64x64xf32>
    %cst_48 = arith.constant dense<0.000000e+00> : vector<16x64xf32>
    %70 = tpu.matmul %68, %69, %cst_48 {dimension_numbers = #tpu.dot_dimension_numbers<[1], [0], [0], [1], [0, 0, 1, 1], [], []>} : vector<16x64xf32>, vector<64x64xf32>, vector<16x64xf32> -> vector<16x64xf32>
    %cst_49 = arith.constant dense<0.000000e+00> : vector<128x64xf32>
    %71 = tpu.matmul %4, %70, %cst_49 {dimension_numbers = #tpu.dot_dimension_numbers<[1], [0], [0], [1], [0, 0, 1, 1], [], []>} : vector<128x16xf32>, vector<16x64xf32>, vector<128x64xf32> -> vector<128x64xf32>
    %72 = arith.mulf %71, %5 : vector<128x64xf32>
    %c0_50 = arith.constant 0 : index
    %c0_51 = arith.constant 0 : index
    %73 = vector.load %arg17[%c0_50, %c0_51] : memref<64x128xf32, #tpu.memory_space<vmem>>, vector<64x128xf32>
    %cst_52 = arith.constant dense<0.000000e+00> : vector<16x128xf32>
    %74 = tpu.matmul %70, %73, %cst_52 {dimension_numbers = #tpu.dot_dimension_numbers<[1], [0], [0], [1], [0, 0, 1, 1], [], []>} : vector<16x64xf32>, vector<64x128xf32>, vector<16x128xf32> -> vector<16x128xf32>
    %c0_53 = arith.constant 0 : index
    %c0_54 = arith.constant 0 : index
    %75 = vector.load %arg18[%c0_53, %c0_54] : memref<1x64xf32, #tpu.memory_space<vmem>>, vector<1x64xf32>
    %cst_55 = arith.constant dense<0.000000e+00> : vector<1x128xf32>
    %76 = tpu.matmul %75, %72, %cst_55 {dimension_numbers = #tpu.dot_dimension_numbers<[1], [1], [0], [0], [0, 0, 1, 0], [], []>} : vector<1x64xf32>, vector<128x64xf32>, vector<1x128xf32> -> vector<1x128xf32>
    %77 = vector.broadcast %76 : vector<1x128xf32> to vector<16x128xf32>
    %78 = arith.addf %74, %77 : vector<16x128xf32>
    %c0_56 = arith.constant 0 : index
    %c0_57 = arith.constant 0 : index
    %79 = vector.load %arg19[%c0_56, %c0_57] : memref<1x128xf32, #tpu.memory_space<vmem>>, vector<1x128xf32>
    %80 = vector.broadcast %79 : vector<1x128xf32> to vector<16x128xf32>
    %81 = arith.mulf %28, %80 : vector<16x128xf32>
    %82 = arith.addf %78, %81 : vector<16x128xf32>
    %cst_58 = arith.constant 0.000000e+00 : f32
    %83 = vector.broadcast %cst_58 : f32 to vector<16x128xf32>
    %84 = arith.cmpf ogt, %82, %83 : vector<16x128xf32>
    %cst_59 = arith.constant 2.000000e-01 : f32
    %85 = vector.broadcast %cst_59 : f32 to vector<16x128xf32>
    %86 = arith.mulf %85, %82 : vector<16x128xf32>
    %87 = arith.select %84, %82, %86 : vector<16x128xi1>, vector<16x128xf32>
    %cst_60 = arith.constant 0.000000e+00 : f32
    %88 = vector.broadcast %cst_60 : f32 to vector<16x128xf32>
    %89 = arith.cmpf ogt, %27, %88 : vector<16x128xf32>
    %cst_61 = arith.constant -1.000000e+30 : f32
    %90 = vector.broadcast %cst_61 : f32 to vector<16x128xf32>
    %91 = arith.select %89, %87, %90 : vector<16x128xi1>, vector<16x128xf32>
    %cst_62 = arith.constant dense<0xFF800000> : vector<16xf32>
    %92 = vector.multi_reduction <maximumf>, %91, %cst_62 [1] : vector<16x128xf32> to vector<16xf32>
    %93 = vector.shape_cast %92 : vector<16xf32> to vector<16x1xf32>
    %94 = vector.broadcast %93 : vector<16x1xf32> to vector<16x128xf32>
    %95 = arith.subf %91, %94 : vector<16x128xf32>
    %96 = math.exp %95 : vector<16x128xf32>
    %97 = arith.mulf %96, %27 : vector<16x128xf32>
    %cst_63 = arith.constant dense<0.000000e+00> : vector<16x128xf32>
    %98 = tpu.matmul %97, %6, %cst_63 {dimension_numbers = #tpu.dot_dimension_numbers<[1], [0], [0], [1], [0, 0, 1, 1], [], []>} : vector<16x128xf32>, vector<128x128xf32>, vector<16x128xf32> -> vector<16x128xf32>
    %cst_64 = arith.constant 9.99999968E-21 : f32
    %99 = vector.broadcast %cst_64 : f32 to vector<16x128xf32>
    %100 = arith.maximumf %98, %99 : vector<16x128xf32>
    %101 = arith.divf %97, %100 : vector<16x128xf32>
    %cst_65 = arith.constant dense<0.000000e+00> : vector<16x64xf32>
    %102 = tpu.matmul %101, %72, %cst_65 {dimension_numbers = #tpu.dot_dimension_numbers<[1], [0], [0], [1], [0, 0, 1, 1], [], []>} : vector<16x128xf32>, vector<128x64xf32>, vector<16x64xf32> -> vector<16x64xf32>
    %c0_66 = arith.constant 0 : index
    %c0_67 = arith.constant 0 : index
    %103 = vector.load %arg20[%c0_66, %c0_67] : memref<1x64xf32, #tpu.memory_space<vmem>>, vector<1x64xf32>
    %104 = vector.broadcast %103 : vector<1x64xf32> to vector<16x64xf32>
    %105 = arith.addf %102, %104 : vector<16x64xf32>
    %cst_68 = arith.constant 0.000000e+00 : f32
    %106 = vector.broadcast %cst_68 : f32 to vector<16x64xf32>
    %107 = arith.maximumf %105, %106 : vector<16x64xf32>
    %c0_69 = arith.constant 0 : index
    %c0_70 = arith.constant 0 : index
    %108 = vector.load %arg21[%c0_69, %c0_70] : memref<64x64xf32, #tpu.memory_space<vmem>>, vector<64x64xf32>
    %cst_71 = arith.constant dense<0.000000e+00> : vector<16x64xf32>
    %109 = tpu.matmul %107, %108, %cst_71 {dimension_numbers = #tpu.dot_dimension_numbers<[1], [0], [0], [1], [0, 0, 1, 1], [], []>} : vector<16x64xf32>, vector<64x64xf32>, vector<16x64xf32> -> vector<16x64xf32>
    %cst_72 = arith.constant dense<0.000000e+00> : vector<128x64xf32>
    %110 = tpu.matmul %4, %109, %cst_72 {dimension_numbers = #tpu.dot_dimension_numbers<[1], [0], [0], [1], [0, 0, 1, 1], [], []>} : vector<128x16xf32>, vector<16x64xf32>, vector<128x64xf32> -> vector<128x64xf32>
    %111 = arith.mulf %110, %5 : vector<128x64xf32>
    %c0_73 = arith.constant 0 : index
    %c0_74 = arith.constant 0 : index
    %112 = vector.load %arg22[%c0_73, %c0_74] : memref<64x128xf32, #tpu.memory_space<vmem>>, vector<64x128xf32>
    %cst_75 = arith.constant dense<0.000000e+00> : vector<16x128xf32>
    %113 = tpu.matmul %109, %112, %cst_75 {dimension_numbers = #tpu.dot_dimension_numbers<[1], [0], [0], [1], [0, 0, 1, 1], [], []>} : vector<16x64xf32>, vector<64x128xf32>, vector<16x128xf32> -> vector<16x128xf32>
    %c0_76 = arith.constant 0 : index
    %c0_77 = arith.constant 0 : index
    %114 = vector.load %arg23[%c0_76, %c0_77] : memref<1x64xf32, #tpu.memory_space<vmem>>, vector<1x64xf32>
    %cst_78 = arith.constant dense<0.000000e+00> : vector<1x128xf32>
    %115 = tpu.matmul %114, %111, %cst_78 {dimension_numbers = #tpu.dot_dimension_numbers<[1], [1], [0], [0], [0, 0, 1, 0], [], []>} : vector<1x64xf32>, vector<128x64xf32>, vector<1x128xf32> -> vector<1x128xf32>
    %116 = vector.broadcast %115 : vector<1x128xf32> to vector<16x128xf32>
    %117 = arith.addf %113, %116 : vector<16x128xf32>
    %c0_79 = arith.constant 0 : index
    %c0_80 = arith.constant 0 : index
    %118 = vector.load %arg24[%c0_79, %c0_80] : memref<1x128xf32, #tpu.memory_space<vmem>>, vector<1x128xf32>
    %119 = vector.broadcast %118 : vector<1x128xf32> to vector<16x128xf32>
    %120 = arith.mulf %28, %119 : vector<16x128xf32>
    %121 = arith.addf %117, %120 : vector<16x128xf32>
    %cst_81 = arith.constant 0.000000e+00 : f32
    %122 = vector.broadcast %cst_81 : f32 to vector<16x128xf32>
    %123 = arith.cmpf ogt, %121, %122 : vector<16x128xf32>
    %cst_82 = arith.constant 2.000000e-01 : f32
    %124 = vector.broadcast %cst_82 : f32 to vector<16x128xf32>
    %125 = arith.mulf %124, %121 : vector<16x128xf32>
    %126 = arith.select %123, %121, %125 : vector<16x128xi1>, vector<16x128xf32>
    %cst_83 = arith.constant 0.000000e+00 : f32
    %127 = vector.broadcast %cst_83 : f32 to vector<16x128xf32>
    %128 = arith.cmpf ogt, %27, %127 : vector<16x128xf32>
    %cst_84 = arith.constant -1.000000e+30 : f32
    %129 = vector.broadcast %cst_84 : f32 to vector<16x128xf32>
    %130 = arith.select %128, %126, %129 : vector<16x128xi1>, vector<16x128xf32>
    %cst_85 = arith.constant dense<0xFF800000> : vector<16xf32>
    %131 = vector.multi_reduction <maximumf>, %130, %cst_85 [1] : vector<16x128xf32> to vector<16xf32>
    %132 = vector.shape_cast %131 : vector<16xf32> to vector<16x1xf32>
    %133 = vector.broadcast %132 : vector<16x1xf32> to vector<16x128xf32>
    %134 = arith.subf %130, %133 : vector<16x128xf32>
    %135 = math.exp %134 : vector<16x128xf32>
    %136 = arith.mulf %135, %27 : vector<16x128xf32>
    %cst_86 = arith.constant dense<0.000000e+00> : vector<16x128xf32>
    %137 = tpu.matmul %136, %6, %cst_86 {dimension_numbers = #tpu.dot_dimension_numbers<[1], [0], [0], [1], [0, 0, 1, 1], [], []>} : vector<16x128xf32>, vector<128x128xf32>, vector<16x128xf32> -> vector<16x128xf32>
    %cst_87 = arith.constant 9.99999968E-21 : f32
    %138 = vector.broadcast %cst_87 : f32 to vector<16x128xf32>
    %139 = arith.maximumf %137, %138 : vector<16x128xf32>
    %140 = arith.divf %136, %139 : vector<16x128xf32>
    %cst_88 = arith.constant dense<0.000000e+00> : vector<16x64xf32>
    %141 = tpu.matmul %140, %111, %cst_88 {dimension_numbers = #tpu.dot_dimension_numbers<[1], [0], [0], [1], [0, 0, 1, 1], [], []>} : vector<16x128xf32>, vector<128x64xf32>, vector<16x64xf32> -> vector<16x64xf32>
    %c0_89 = arith.constant 0 : index
    %c0_90 = arith.constant 0 : index
    %142 = vector.load %arg25[%c0_89, %c0_90] : memref<1x64xf32, #tpu.memory_space<vmem>>, vector<1x64xf32>
    %143 = vector.broadcast %142 : vector<1x64xf32> to vector<16x64xf32>
    %144 = arith.addf %141, %143 : vector<16x64xf32>
    %cst_91 = arith.constant 0.000000e+00 : f32
    %145 = vector.broadcast %cst_91 : f32 to vector<16x64xf32>
    %146 = arith.maximumf %144, %145 : vector<16x64xf32>
    %c0_92 = arith.constant 0 : index
    %c0_93 = arith.constant 0 : index
    %147 = vector.load %arg9[%c0_92, %c0_93] : memref<16x16xf32, #tpu.memory_space<vmem>>, vector<16x16xf32>
    %cst_94 = arith.constant dense<0.000000e+00> : vector<16x64xf32>
    %148 = tpu.matmul %147, %146, %cst_94 {dimension_numbers = #tpu.dot_dimension_numbers<[1], [0], [0], [1], [0, 0, 1, 1], [], []>} : vector<16x16xf32>, vector<16x64xf32>, vector<16x64xf32> -> vector<16x64xf32>
    %c0_95 = arith.constant 0 : index
    %c0_96 = arith.constant 0 : index
    %149 = vector.load %arg10[%c0_95, %c0_96] : memref<16x16xf32, #tpu.memory_space<vmem>>, vector<16x16xf32>
    %cst_97 = arith.constant dense<0.000000e+00> : vector<16x64xf32>
    %150 = tpu.matmul %149, %146, %cst_97 {dimension_numbers = #tpu.dot_dimension_numbers<[1], [0], [0], [1], [0, 0, 1, 1], [], []>} : vector<16x16xf32>, vector<16x64xf32>, vector<16x64xf32> -> vector<16x64xf32>
    %c0_98 = arith.constant 0 : index
    %c0_99 = arith.constant 0 : index
    %151 = vector.load %arg26[%c0_98, %c0_99] : memref<64x32xf32, #tpu.memory_space<vmem>>, vector<64x32xf32>
    %cst_100 = arith.constant dense<0.000000e+00> : vector<16x32xf32>
    %152 = tpu.matmul %148, %151, %cst_100 {dimension_numbers = #tpu.dot_dimension_numbers<[1], [0], [0], [1], [0, 0, 1, 1], [], []>} : vector<16x64xf32>, vector<64x32xf32>, vector<16x32xf32> -> vector<16x32xf32>
    %c0_101 = arith.constant 0 : index
    %c0_102 = arith.constant 0 : index
    %153 = vector.load %arg27[%c0_101, %c0_102] : memref<64x32xf32, #tpu.memory_space<vmem>>, vector<64x32xf32>
    %cst_103 = arith.constant dense<0.000000e+00> : vector<16x32xf32>
    %154 = tpu.matmul %150, %153, %cst_103 {dimension_numbers = #tpu.dot_dimension_numbers<[1], [0], [0], [1], [0, 0, 1, 1], [], []>} : vector<16x64xf32>, vector<64x32xf32>, vector<16x32xf32> -> vector<16x32xf32>
    %155 = arith.addf %152, %154 : vector<16x32xf32>
    %c0_104 = arith.constant 0 : index
    %c0_105 = arith.constant 0 : index
    %156 = vector.load %arg28[%c0_104, %c0_105] : memref<1x32xf32, #tpu.memory_space<vmem>>, vector<1x32xf32>
    %157 = vector.broadcast %156 : vector<1x32xf32> to vector<16x32xf32>
    %158 = arith.addf %155, %157 : vector<16x32xf32>
    %cst_106 = arith.constant 0.000000e+00 : f32
    %159 = vector.broadcast %cst_106 : f32 to vector<16x32xf32>
    %160 = arith.maximumf %158, %159 : vector<16x32xf32>
    %c0_107 = arith.constant 0 : index
    %c0_108 = arith.constant 0 : index
    %161 = vector.load %arg29[%c0_107, %c0_108] : memref<32x128xf32, #tpu.memory_space<vmem>>, vector<32x128xf32>
    %cst_109 = arith.constant dense<0.000000e+00> : vector<16x128xf32>
    %162 = tpu.matmul %160, %161, %cst_109 {dimension_numbers = #tpu.dot_dimension_numbers<[1], [0], [0], [1], [0, 0, 1, 1], [], []>} : vector<16x32xf32>, vector<32x128xf32>, vector<16x128xf32> -> vector<16x128xf32>
    %c0_110 = arith.constant 0 : index
    %c0_111 = arith.constant 0 : index
    %163 = vector.load %arg30[%c0_110, %c0_111] : memref<1x128xf32, #tpu.memory_space<vmem>>, vector<1x128xf32>
    %164 = vector.broadcast %163 : vector<1x128xf32> to vector<16x128xf32>
    %165 = arith.addf %162, %164 : vector<16x128xf32>
    %c0_112 = arith.constant 0 : index
    %c0_113 = arith.constant 0 : index
    %166 = vector.load %arg31[%c0_112, %c0_113] : memref<16x128xf32, #tpu.memory_space<vmem>>, vector<16x128xf32>
    tpu.vector_store %arg31[%c0_112, %c0_113], %165 {strides = array<i32>} : memref<16x128xf32, #tpu.memory_space<vmem>>, vector<16x128xf32>,
    return
  }
  func.func @transform_0(%arg0: i32) -> (i32, i32) {
    %c0_i32 = arith.constant 0 : i32
    %c0_i32_0 = arith.constant 0 : i32
    %c0_i32_1 = arith.constant 0 : i32
    return %c0_i32, %c0_i32_0 : i32, i32
  }
  func.func @transform_1(%arg0: i32) -> (i32, i32) {
    %c0_i32 = arith.constant 0 : i32
    %c0_i32_0 = arith.constant 0 : i32
    %c0_i32_1 = arith.constant 0 : i32
    return %c0_i32, %c0_i32_0 : i32, i32
  }
  func.func @transform_2(%arg0: i32) -> (i32, i32) {
    %c0_i32 = arith.constant 0 : i32
    %c0_i32_0 = arith.constant 0 : i32
    %c0_i32_1 = arith.constant 0 : i32
    return %c0_i32, %c0_i32_0 : i32, i32
  }
  func.func @transform_3(%arg0: i32) -> (i32, i32) {
    %c0_i32 = arith.constant 0 : i32
    %c0_i32_0 = arith.constant 0 : i32
    %c0_i32_1 = arith.constant 0 : i32
    return %c0_i32, %c0_i32_0 : i32, i32
  }
  func.func @transform_4(%arg0: i32) -> (i32, i32) {
    %c0_i32 = arith.constant 0 : i32
    %c0_i32_0 = arith.constant 0 : i32
    %c0_i32_1 = arith.constant 0 : i32
    return %c0_i32, %c0_i32_0 : i32, i32
  }
  func.func @transform_5(%arg0: i32) -> (i32, i32) {
    %c0_i32 = arith.constant 0 : i32
    %c0_i32_0 = arith.constant 0 : i32
    %c0_i32_1 = arith.constant 0 : i32
    return %c0_i32, %c0_i32_0 : i32, i32
  }
  func.func @transform_6(%arg0: i32) -> (i32, i32) {
    %c0_i32 = arith.constant 0 : i32
    %c0_i32_0 = arith.constant 0 : i32
    %c0_i32_1 = arith.constant 0 : i32
    return %c0_i32, %c0_i32_0 : i32, i32
  }
  func.func @transform_7(%arg0: i32) -> (i32, i32) {
    %c0_i32 = arith.constant 0 : i32
    %c0_i32_0 = arith.constant 0 : i32
    %c0_i32_1 = arith.constant 0 : i32
    return %c0_i32, %c0_i32_0 : i32, i32
  }
  func.func @transform_8(%arg0: i32) -> (i32, i32) {
    %c0_i32 = arith.constant 0 : i32
    %c0_i32_0 = arith.constant 0 : i32
    %c0_i32_1 = arith.constant 0 : i32
    return %c0_i32, %c0_i32_0 : i32, i32
  }
  func.func @transform_9(%arg0: i32) -> (i32, i32) {
    %c0_i32 = arith.constant 0 : i32
    %c0_i32_0 = arith.constant 0 : i32
    %c0_i32_1 = arith.constant 0 : i32
    return %c0_i32, %c0_i32_0 : i32, i32
  }
  func.func @transform_10(%arg0: i32) -> (i32, i32) {
    %c0_i32 = arith.constant 0 : i32
    %c0_i32_0 = arith.constant 0 : i32
    %c0_i32_1 = arith.constant 0 : i32
    return %c0_i32, %c0_i32_0 : i32, i32
  }
  func.func @transform_11(%arg0: i32) -> (i32, i32) {
    %c0_i32 = arith.constant 0 : i32
    %c0_i32_0 = arith.constant 0 : i32
    %c0_i32_1 = arith.constant 0 : i32
    return %c0_i32, %c0_i32_0 : i32, i32
  }
  func.func @transform_12(%arg0: i32) -> (i32, i32) {
    %c0_i32 = arith.constant 0 : i32
    %c0_i32_0 = arith.constant 0 : i32
    %c0_i32_1 = arith.constant 0 : i32
    return %c0_i32, %c0_i32_0 : i32, i32
  }
  func.func @transform_13(%arg0: i32) -> (i32, i32) {
    %c0_i32 = arith.constant 0 : i32
    %c0_i32_0 = arith.constant 0 : i32
    %c0_i32_1 = arith.constant 0 : i32
    return %c0_i32, %c0_i32_0 : i32, i32
  }
  func.func @transform_14(%arg0: i32) -> (i32, i32) {
    %c0_i32 = arith.constant 0 : i32
    %c0_i32_0 = arith.constant 0 : i32
    %c0_i32_1 = arith.constant 0 : i32
    return %c0_i32, %c0_i32_0 : i32, i32
  }
  func.func @transform_15(%arg0: i32) -> (i32, i32) {
    %c0_i32 = arith.constant 0 : i32
    %c0_i32_0 = arith.constant 0 : i32
    %c0_i32_1 = arith.constant 0 : i32
    return %c0_i32, %c0_i32_0 : i32, i32
  }
  func.func @transform_16(%arg0: i32) -> (i32, i32) {
    %c0_i32 = arith.constant 0 : i32
    %c0_i32_0 = arith.constant 0 : i32
    %c0_i32_1 = arith.constant 0 : i32
    return %c0_i32, %c0_i32_0 : i32, i32
  }
  func.func @transform_17(%arg0: i32) -> (i32, i32) {
    %c0_i32 = arith.constant 0 : i32
    %c0_i32_0 = arith.constant 0 : i32
    %c0_i32_1 = arith.constant 0 : i32
    return %c0_i32, %c0_i32_0 : i32, i32
  }
  func.func @transform_18(%arg0: i32) -> (i32, i32) {
    %c0_i32 = arith.constant 0 : i32
    %c0_i32_0 = arith.constant 0 : i32
    %c0_i32_1 = arith.constant 0 : i32
    return %c0_i32, %c0_i32_0 : i32, i32
  }
  func.func @transform_19(%arg0: i32) -> (i32, i32) {
    %c0_i32 = arith.constant 0 : i32
    %c0_i32_0 = arith.constant 0 : i32
    %c0_i32_1 = arith.constant 0 : i32
    return %c0_i32, %c0_i32_0 : i32, i32
  }
  func.func @transform_20(%arg0: i32) -> (i32, i32) {
    %c0_i32 = arith.constant 0 : i32
    %c0_i32_0 = arith.constant 0 : i32
    %c0_i32_1 = arith.constant 0 : i32
    return %c0_i32, %c0_i32_0 : i32, i32
  }
  func.func @transform_21(%arg0: i32) -> (i32, i32) {
    %c0_i32 = arith.constant 0 : i32
    %c0_i32_0 = arith.constant 0 : i32
    %c0_i32_1 = arith.constant 0 : i32
    return %c0_i32, %c0_i32_0 : i32, i32
  }
  func.func @transform_22(%arg0: i32) -> (i32, i32) {
    %c0_i32 = arith.constant 0 : i32
    %c0_i32_0 = arith.constant 0 : i32
    %c0_i32_1 = arith.constant 0 : i32
    return %c0_i32, %c0_i32_0 : i32, i32
  }
  func.func @transform_23(%arg0: i32) -> (i32, i32) {
    %c0_i32 = arith.constant 0 : i32
    %c0_i32_0 = arith.constant 0 : i32
    %c0_i32_1 = arith.constant 0 : i32
    return %c0_i32, %c0_i32_0 : i32, i32
  }
  func.func @transform_24(%arg0: i32) -> (i32, i32) {
    %c0_i32 = arith.constant 0 : i32
    %c0_i32_0 = arith.constant 0 : i32
    %c0_i32_1 = arith.constant 0 : i32
    return %c0_i32, %c0_i32_0 : i32, i32
  }
  func.func @transform_25(%arg0: i32) -> (i32, i32) {
    %c0_i32 = arith.constant 0 : i32
    %c0_i32_0 = arith.constant 0 : i32
    %c0_i32_1 = arith.constant 0 : i32
    return %c0_i32, %c0_i32_0 : i32, i32
  }
  func.func @transform_26(%arg0: i32) -> (i32, i32) {
    %c0_i32 = arith.constant 0 : i32
    %c0_i32_0 = arith.constant 0 : i32
    %c0_i32_1 = arith.constant 0 : i32
    return %c0_i32, %c0_i32_0 : i32, i32
  }
  func.func @transform_27(%arg0: i32) -> (i32, i32) {
    %c0_i32 = arith.constant 0 : i32
    %c0_i32_0 = arith.constant 0 : i32
    %c0_i32_1 = arith.constant 0 : i32
    return %c0_i32, %c0_i32_0 : i32, i32
  }
  func.func @transform_28(%arg0: i32) -> (i32, i32) {
    %c0_i32 = arith.constant 0 : i32
    %c0_i32_0 = arith.constant 0 : i32
    %c0_i32_1 = arith.constant 0 : i32
    return %c0_i32, %c0_i32_0 : i32, i32
  }
  func.func @transform_29(%arg0: i32) -> (i32, i32) {
    %c0_i32 = arith.constant 0 : i32
    %c0_i32_0 = arith.constant 0 : i32
    %c0_i32_1 = arith.constant 0 : i32
    return %c0_i32, %c0_i32_0 : i32, i32
  }
  func.func @transform_30(%arg0: i32) -> (i32, i32) {
    %c0_i32 = arith.constant 0 : i32
    %c0_i32_0 = arith.constant 0 : i32
    %c0_i32_1 = arith.constant 0 : i32
    return %c0_i32, %c0_i32_0 : i32, i32
  }
}

</mosaic_0001>

<bundles_post_ra>
// kernel: tpu_custom_call.1
= control target key start
LH: loop header
LB: loop body
LE: loop exit
PB: predicated region body
PF: predicated region fallthrough
CT: control target
= control target key end

     0   :  { %s5063_s6 = smov 1   ;;  %s5064_s10 = smov 2   ;;  %s5993_s0 = inlined_call_operand.smem [shape: u32[31], index: -1, kind: input, shape index: {}] }
   0x1   :  { %s5118_s5 = sld [smem:[%s5993_s0]]   ;;  %s5065_s14 = smov 3  }
   0x2   :  { %s5123_s9 = sld [smem:[%s5993_s0 + %s5063_s6]]   ;;  %s5066_s18 = smov 4  }
   0x3   :  { %s5128_s13 = sld [smem:[%s5993_s0 + %s5064_s10]]   ;;  %s5067_s22 = smov 5  }
   0x4   :  { %s5133_s17 = sld [smem:[%s5993_s0 + %s5065_s14]]   ;;  %s5068_s26 = smov 6  }
   0x5   :  { %s5138_s21 = sld [smem:[%s5993_s0 + %s5066_s18]]   ;;  %s5069_s30 = smov 7  }
   0x6   :  { %s5143_s25 = sld [smem:[%s5993_s0 + %s5067_s22]]   ;;  %s5070_s4 = smov 8  }
   0x7   :  { %s5148_s29 = sld [smem:[%s5993_s0 + %s5068_s26]]   ;;  %s5071_s10 = smov 9  }
   0x8   :  { %s5153_s3 = sld [smem:[%s5993_s0 + %s5069_s30]]   ;;  %s5072_s15 = smov 10  }
   0x9   :  { %s5158_s8 = sld [smem:[%s5993_s0 + %s5070_s4]]   ;;  %s5073_s20 = smov 11  }
   0xa   :  { %s5163_s14 = sld [smem:[%s5993_s0 + %s5071_s10]]   ;;  %s5074_s26 = smov 12  }
   0xb   :  { %s5168_s19 = sld [smem:[%s5993_s0 + %s5072_s15]]   ;;  %s5075_s1 = smov 13  }
   0xc   :  { %s5173_s24 = sld [smem:[%s5993_s0 + %s5073_s20]]   ;;  %s5076_s7 = smov 14  }
   0xd   :  { %6010 = sst [smem:[#allocation28_spill]] %s5148_s29  ;;  %s5077_s15 = smov 15  }
   0xe   :  { %6011 = sst [smem:[#allocation29_spill]] %s5153_s3  ;;  %s5078_s22 = smov 16  }
   0xf   :  { %s5178_s30 = sld [smem:[%s5993_s0 + %s5074_s26]]   ;;  %s5079_s28 = smov 17  }
  0x10   :  { %s5183_s6 = sld [smem:[%s5993_s0 + %s5075_s1]]  }
  0x11   :  { %s5188_s12 = sld [smem:[%s5993_s0 + %s5076_s7]]   ;;  %s5080_s7 = smov 18  }
  0x12   :  { %s5193_s20 = sld [smem:[%s5993_s0 + %s5077_s15]]   ;;  %s5081_s15 = smov 19  }
  0x13   :  { %s5198_s27 = sld [smem:[%s5993_s0 + %s5078_s22]]   ;;  %s5082_s22 = smov 20  }
  0x14   :  { %s5203_s4 = sld [smem:[%s5993_s0 + %s5079_s28]]   ;;  %s5083_s28 = smov 21  }
  0x15   :  { %s5208_s3 = sld [smem:[%s5993_s0 + %s5080_s7]]   ;;  %s5084_s7 = smov 22  }
  0x16   :  { %s5223_s29 = sld [smem:[%s5993_s0 + %s5083_s28]]   ;;  %s5087_s28 = smov 25  }
  0x18   :  { %6012 = sst [smem:[#allocation30_spill]] %s5193_s20 }
  0x19   :  { %6013 = sst [smem:[#allocation31_spill]] %s5198_s27 }
  0x1a   :  { %s5213_s20 = sld [smem:[%s5993_s0 + %s5081_s15]]   ;;  %s5085_s15 = smov 23  }
  0x1b   :  { %6014 = sst [smem:[#allocation32_spill]] %s5208_s3 }
  0x1c   :  { %s5218_s27 = sld [smem:[%s5993_s0 + %s5082_s22]]   ;;  %s5086_s22 = smov 24  }
  0x1d   :  { %6017 = sst [smem:[#allocation35_spill]] %s5223_s29 }
  0x1e   :  { %s5228_s3 = sld [smem:[%s5993_s0 + %s5084_s7]]   ;;  %s5088_s7 = smov 26  }
  0x1f   :  { %s5243_s29 = sld [smem:[%s5993_s0 + %s5087_s28]]   ;;  %s5091_s28 = smov 29  }
  0x20   :  { %6015 = sst [smem:[#allocation33_spill]] %s5213_s20 }
  0x21   :  { %s5233_s20 = sld [smem:[%s5993_s0 + %s5085_s15]]   ;;  %s5089_s15 = smov 27  }
  0x22   :  { %6016 = sst [smem:[#allocation34_spill]] %s5218_s27 }
  0x23   :  { %s5238_s27 = sld [smem:[%s5993_s0 + %s5086_s22]]   ;;  %s5090_s22 = smov 28  }
  0x24   :  { %6018 = sst [smem:[#allocation36_spill]] %s5228_s3 }
  0x25   :  { %6021 = sst [smem:[#allocation39_spill]] %s5243_s29 }
  0x26   :  { %s5248_s3 = sld [smem:[%s5993_s0 + %s5088_s7]]   ;;  %s5092_s7 = smov 30  }
  0x27   :  { %6019 = sst [smem:[#allocation37_spill]] %s5233_s20 }
  0x28   :  { %s5253_s20 = sld [smem:[%s5993_s0 + %s5089_s15]]  }
  0x29   :  { %6020 = sst [smem:[#allocation38_spill]] %s5238_s27 }
  0x2a   :  { %s5258_s27 = sld [smem:[%s5993_s0 + %s5090_s22]]  }
  0x2b   :  { %s5263_s29 = sld [smem:[%s5993_s0 + %s5091_s28]]  }
  0x2c   :  { %6022 = sst [smem:[#allocation40_spill]] %s5248_s3 }
  0x2d   :  { %s5268_s3 = sld [smem:[%s5993_s0 + %s5092_s7]]  }
  0x2e   :  { %66 = vsyncpa [#allocation3], 0 }
  0x2f   :  { %67 = vsyncpa [#allocation6], 0 }
  0x30   :  { %68 = vsyncpa [#allocation9], 0 }
  0x31   :  { %69 = vsyncpa [#allocation12], 0 }
  0x32   :  { %70 = vsyncpa [#allocation15], 0 }
  0x33   :  { %71 = vsyncpa [#allocation18], 0 }
  0x34   :  { %72 = vsyncpa [#allocation4], 0  ;;  %s5093_s15 = smov [#allocation5]   ;;  %s5094_s18 = smov [#allocation8]  }
  0x35   :  { %s92_s16 = sshll.u32 %s5093_s15, 4  ;;  %s116_s22 = sshll.u32 %s5094_s18, 4  ;;  %s93_s16 = int_to_ptr.vmem [resolvable:$true] %s92_s16  ;;  %s5270_s22 = int_to_ptr.vmem [resolvable:$true] %s116_s22 }
  0x36   :  { %s4785_s23 = scalar_lea.hbm %s5128_s13, 256 }
  0x37   :  { %p4786_p0 = scmp.ne.s32.totalorder %s5128_s13, %s4785_s23  ;;  %p4789_p1 = scmp.lt.u32.totalorder %s4785_s23, %s5128_s13 }
  0x39   :  { %p4791_p2 = pnand %p4789_p1, %p4786_p0 }
  0x3b   :  { %4794 = shalt.err (!%p4791_p2)
}
  0x3c   :  { %s4795_s0 = scalar_lea.vmem %s93_s16, 256  ;;  %p4800_p4 = scmp.lt.s32.totalorder %s93_s16, %s93_s16 }
  0x3d   :  { %p4796_p3 = scmp.ne.s32.totalorder %s93_s16, %s4795_s0  ;;  %p4801_p5 = scmp.lt.s32.totalorder %s4795_s0, %s4795_s0 }
  0x3f   :  { %p4802_p6 = por %p4801_p5, %p4800_p4 }
  0x41   :  { %p4803_p7 = pnand %p4802_p6, %p4796_p3 }
  0x43   :  { %4806 = shalt.err (!%p4803_p7)
}
  0x44   :  { %s5095_s26 = smov 128   ;;  %s5096_s28 = smov 8  }
  0x45   :  { %98 = dma.hbm_to_vmem [thread:$0]  %s5128_s13, 256, %s93_s16, [#allocation6], %s5095_s26, %s5095_s26, %s5096_s28  }
  0x46   :  { %s4807_s1 = scalar_lea.hbm %s5138_s21, 256 }
  0x47   :  { %p4808_p8 = scmp.ne.s32.totalorder %s5138_s21, %s4807_s1  ;;  %p4811_p9 = scmp.lt.u32.totalorder %s4807_s1, %s5138_s21 }
  0x49   :  { %p4813_p10 = pnand %p4811_p9, %p4808_p8 }
  0x4b   :  { %4816 = shalt.err (!%p4813_p10)
}
  0x4c   :  { %s4817_s2 = scalar_lea.vmem %s5270_s22, 256  ;;  %p4822_p12 = scmp.lt.s32.totalorder %s5270_s22, %s5270_s22 }
  0x4d   :  { %p4818_p11 = scmp.ne.s32.totalorder %s5270_s22, %s4817_s2  ;;  %p4823_p13 = scmp.lt.s32.totalorder %s4817_s2, %s4817_s2 }
  0x4f   :  { %p4824_p0 = por %p4823_p13, %p4822_p12 }
  0x51   :  { %p4825_p1 = pnand %p4824_p0, %p4818_p11 }
  0x53   :  { %4828 = shalt.err (!%p4825_p1)
}
  0x54   :  { %122 = dma.hbm_to_vmem [thread:$0]  %s5138_s21, 256, %s5270_s22, [#allocation9], %s5095_s26, %s5095_s26, %s5096_s28  }
  0x55   :  { %s5097_s13 = smov [#allocation11]   ;;  %s5098_s10 = smov [#allocation14]  }
  0x56   :  { %s146_s7 = sshll.u32 %s5097_s13, 4  ;;  %s171_s11 = sshll.u32 %s5098_s10, 4  ;;  %s147_s7 = int_to_ptr.vmem [resolvable:$true] %s146_s7  ;;  %s172_s11 = int_to_ptr.vmem [resolvable:$true] %s171_s11 }
  0x57   :  { %s4829_s15 = scalar_lea.hbm %s5163_s14, 256 }
  0x58   :  { %p4830_p2 = scmp.ne.s32.totalorder %s5163_s14, %s4829_s15  ;;  %p4833_p3 = scmp.lt.u32.totalorder %s4829_s15, %s5163_s14 }
  0x5a   :  { %p4835_p4 = pnand %p4833_p3, %p4830_p2 }
  0x5c   :  { %4838 = shalt.err (!%p4835_p4)
}
  0x5d   :  { %s4839_s16 = scalar_lea.vmem %s147_s7, 256  ;;  %p4844_p6 = scmp.lt.s32.totalorder %s147_s7, %s147_s7 }
  0x5e   :  { %p4840_p5 = scmp.ne.s32.totalorder %s147_s7, %s4839_s16  ;;  %p4845_p7 = scmp.lt.s32.totalorder %s4839_s16, %s4839_s16 }
  0x60   :  { %p4846_p8 = por %p4845_p7, %p4844_p6 }
  0x62   :  { %p4847_p9 = pnand %p4846_p8, %p4840_p5 }
  0x64   :  { %4850 = shalt.err (!%p4847_p9)
}
  0x65   :  { %152 = dma.hbm_to_vmem [thread:$0]  %s5163_s14, 256, %s147_s7, [#allocation12], %s5095_s26, %s5095_s26, %s5096_s28  }
  0x66   :  { %s4851_s21 = scalar_lea.hbm %s5178_s30, 16 }
  0x67   :  { %p4852_p10 = scmp.ne.s32.totalorder %s5178_s30, %s4851_s21  ;;  %p4855_p11 = scmp.lt.u32.totalorder %s4851_s21, %s5178_s30 }
  0x69   :  { %p4857_p12 = pnand %p4855_p11, %p4852_p10 }
  0x6b   :  { %4860 = shalt.err (!%p4857_p12)
}
  0x6c   :  { %s4861_s18 = scalar_lea.vmem %s172_s11, 16  ;;  %s4865_s22 = scalar_lea.vmem %s172_s11, 32 }
  0x6d   :  { %p4862_p13 = scmp.ne.s32.totalorder %s172_s11, %s4861_s18  ;;  %p4866_p0 = scmp.lt.s32.totalorder %s172_s11, %s172_s11 }
  0x6e   :  { %p4867_p1 = scmp.lt.s32.totalorder %s4865_s22, %s4861_s18 }
  0x70   :  { %p4868_p2 = por %p4867_p1, %p4866_p0 }
  0x72   :  { %p4869_p3 = pnand %p4868_p2, %p4862_p13 }
  0x74   :  { %4872 = shalt.err (!%p4869_p3)
}
  0x75   :  { %174 = dma.hbm_to_vmem [thread:$0]  %s5178_s30, 16, %s172_s11, [#allocation15]  }
  0x76   :  { %s5099_s23 = smov [#allocation17]   ;;  %s5100_s0 = smov [#allocation2]  }
  0x77   :  { %s191_s14 = sshll.u32 %s5099_s23, 4  ;;  %s80_s1 = sshll.u32 %s5100_s0, 4  ;;  %s192_s14 = int_to_ptr.vmem [resolvable:$true] %s191_s14  ;;  %s5302_s1 = int_to_ptr.vmem [resolvable:$true] %s80_s1 }
  0x78   :  { %s4873_s2 = scalar_lea.hbm %s5188_s12, 16 }
  0x79   :  { %p4874_p4 = scmp.ne.s32.totalorder %s5188_s12, %s4873_s2  ;;  %p4877_p5 = scmp.lt.u32.totalorder %s4873_s2, %s5188_s12 }
  0x7b   :  { %p4879_p6 = pnand %p4877_p5, %p4874_p4 }
  0x7d   :  { %4882 = shalt.err (!%p4879_p6)
}
  0x7e   :  { %s4883_s13 = scalar_lea.vmem %s192_s14, 16  ;;  %s4887_s7 = scalar_lea.vmem %s192_s14, 32 }
  0x7f   :  { %p4884_p7 = scmp.ne.s32.totalorder %s192_s14, %s4883_s13  ;;  %p4888_p8 = scmp.lt.s32.totalorder %s192_s14, %s192_s14 }
  0x80   :  { %p4889_p9 = scmp.lt.s32.totalorder %s4887_s7, %s4883_s13 }
  0x82   :  { %p4890_p10 = por %p4889_p9, %p4888_p8 }
  0x84   :  { %p4891_p11 = pnand %p4890_p10, %p4884_p7 }
  0x86   :  { %4894 = shalt.err (!%p4891_p11)
}
  0x87   :  { %194 = dma.hbm_to_vmem [thread:$0]  %s5188_s12, 16, %s192_s14, [#allocation18]  }
  0x88   :  { %s4895_s30 = scalar_lea.hbm %s5123_s9, 256 }
  0x89   :  { %p4896_p12 = scmp.ne.s32.totalorder %s5123_s9, %s4895_s30  ;;  %p4899_p13 = scmp.lt.u32.totalorder %s4895_s30, %s5123_s9 }
  0x8b   :  { %p4901_p0 = pnand %p4899_p13, %p4896_p12 }
  0x8d   :  { %4904 = shalt.err (!%p4901_p0)
}
  0x8e   :  { %s4905_s10 = scalar_lea.vmem %s5302_s1, 256  ;;  %p4910_p2 = scmp.lt.s32.totalorder %s5302_s1, %s5302_s1 }
  0x8f   :  { %p4906_p1 = scmp.ne.s32.totalorder %s5302_s1, %s4905_s10  ;;  %p4911_p3 = scmp.lt.s32.totalorder %s4905_s10, %s4905_s10 }
  0x91   :  { %p4912_p4 = por %p4911_p3, %p4910_p2 }
  0x93   :  { %p4913_p5 = pnand %p4912_p4, %p4906_p1 }
  0x95   :  { %4916 = shalt.err (!%p4913_p5)
}
  0x96   :  { %86 = dma.hbm_to_vmem [thread:$0]  %s5123_s9, 256, %s5302_s1, [#allocation3], %s5095_s26, %s5095_s26, %s5096_s28  }
  0x97   :  { %s5101_s12 = smov [#allocation7]   ;;  %s5102_s15 = smov [#allocation10]  }
  0x98   :  { %s104_s11 = sshll.u32 %s5101_s12, 4  ;;  %s134_s16 = sshll.u32 %s5102_s15, 4  ;;  %s105_s11 = int_to_ptr.vmem [resolvable:$true] %s104_s11  ;;  %s5320_s16 = int_to_ptr.vmem [resolvable:$true] %s134_s16 }
  0x99   :  { %s4917_s21 = scalar_lea.hbm %s5133_s17, 256 }
  0x9a   :  { %p4918_p6 = scmp.ne.s32.totalorder %s5133_s17, %s4917_s21  ;;  %p4921_p7 = scmp.lt.u32.totalorder %s4917_s21, %s5133_s17 }
  0x9c   :  { %p4923_p8 = pnand %p4921_p7, %p4918_p6 }
  0x9e   :  { %4926 = shalt.err (!%p4923_p8)
}
  0x9f   :  { %s4927_s18 = scalar_lea.vmem %s105_s11, 256  ;;  %p4932_p10 = scmp.lt.s32.totalorder %s105_s11, %s105_s11 }
  0xa0   :  { %p4928_p9 = scmp.ne.s32.totalorder %s105_s11, %s4927_s18  ;;  %p4933_p11 = scmp.lt.s32.totalorder %s4927_s18, %s4927_s18 }
  0xa2   :  { %p4934_p12 = por %p4933_p11, %p4932_p10 }
  0xa4   :  { %p4935_p13 = pnand %p4934_p12, %p4928_p9 }
  0xa6   :  { %4938 = shalt.err (!%p4935_p13)
}
  0xa7   :  { %110 = dma.hbm_to_vmem [thread:$0]  %s5133_s17, 256, %s105_s11, [#allocation6], %s5095_s26, %s5095_s26, %s5096_s28  }
  0xa8   :  { %s4939_s9 = scalar_lea.hbm %s5158_s8, 256 }
  0xa9   :  { %p4940_p0 = scmp.ne.s32.totalorder %s5158_s8, %s4939_s9  ;;  %p4943_p1 = scmp.lt.u32.totalorder %s4939_s9, %s5158_s8 }
  0xab   :  { %p4945_p2 = pnand %p4943_p1, %p4940_p0 }
  0xad   :  { %4948 = shalt.err (!%p4945_p2)
}
  0xae   :  { %s4949_s22 = scalar_lea.vmem %s5320_s16, 256  ;;  %p4954_p4 = scmp.lt.s32.totalorder %s5320_s16, %s5320_s16 }
  0xaf   :  { %p4950_p3 = scmp.ne.s32.totalorder %s5320_s16, %s4949_s22  ;;  %p4955_p5 = scmp.lt.s32.totalorder %s4949_s22, %s4949_s22 }
  0xb1   :  { %p4956_p6 = por %p4955_p5, %p4954_p4 }
  0xb3   :  { %p4957_p7 = pnand %p4956_p6, %p4950_p3 }
  0xb5   :  { %4960 = shalt.err (!%p4957_p7)
}
  0xb6   :  { %140 = dma.hbm_to_vmem [thread:$0]  %s5158_s8, 256, %s5320_s16, [#allocation9], %s5095_s26, %s5095_s26, %s5096_s28  }
  0xb7   :  { %s5103_s17 = smov [#allocation13]   ;;  %s5104_s14 = smov [#allocation16]  }
  0xb8   :  { %s159_s23 = sshll.u32 %s5103_s17, 4  ;;  %s181_s0 = sshll.u32 %s5104_s14, 4  ;;  %s160_s23 = int_to_ptr.vmem [resolvable:$true] %s159_s23  ;;  %s182_s0 = int_to_ptr.vmem [resolvable:$true] %s181_s0 }
  0xb9   :  { %s4961_s1 = scalar_lea.hbm %s5168_s19, 64 }
  0xba   :  { %p4962_p8 = scmp.ne.s32.totalorder %s5168_s19, %s4961_s1  ;;  %p4965_p9 = scmp.lt.u32.totalorder %s4961_s1, %s5168_s19 }
  0xbc   :  { %p4967_p10 = pnand %p4965_p9, %p4962_p8 }
  0xbe   :  { %4970 = shalt.err (!%p4967_p10)
}
  0xbf   :  { %s4971_s2 = scalar_lea.vmem %s160_s23, 64  ;;  %p4976_p12 = scmp.lt.s32.totalorder %s160_s23, %s160_s23 }
  0xc0   :  { %p4972_p11 = scmp.ne.s32.totalorder %s160_s23, %s4971_s2  ;;  %p4977_p13 = scmp.lt.s32.totalorder %s4971_s2, %s4971_s2 }
  0xc2   :  { %p4978_p0 = por %p4977_p13, %p4976_p12 }
  0xc4   :  { %p4979_p1 = pnand %p4978_p0, %p4972_p11 }
  0xc6   :  { %4982 = shalt.err (!%p4979_p1)
}
  0xc7   :  { %162 = dma.hbm_to_vmem [thread:$0]  %s5168_s19, 64, %s160_s23, [#allocation12]  }
  0xc8   :  { %s4983_s8 = scalar_lea.hbm %s5183_s6, 16 }
  0xc9   :  { %p4984_p2 = scmp.ne.s32.totalorder %s5183_s6, %s4983_s8  ;;  %p4987_p3 = scmp.lt.u32.totalorder %s4983_s8, %s5183_s6 }
  0xcb   :  { %p4989_p4 = pnand %p4987_p3, %p4984_p2 }
  0xcd   :  { %4992 = shalt.err (!%p4989_p4)
}
  0xce   :  { %s4993_s13 = scalar_lea.vmem %s182_s0, 16  ;;  %s4997_s7 = scalar_lea.vmem %s182_s0, 32 }
  0xcf   :  { %p4994_p5 = scmp.ne.s32.totalorder %s182_s0, %s4993_s13  ;;  %p4998_p6 = scmp.lt.s32.totalorder %s182_s0, %s182_s0 }
  0xd0   :  { %p4999_p7 = scmp.lt.s32.totalorder %s4997_s7, %s4993_s13 }
  0xd2   :  { %p5000_p8 = por %p4999_p7, %p4998_p6 }
  0xd4   :  { %p5001_p9 = pnand %p5000_p8, %p4994_p5 }
  0xd6   :  { %5004 = shalt.err (!%p5001_p9)
}
  0xd7   :  { %184 = dma.hbm_to_vmem [thread:$0]  %s5183_s6, 16, %s182_s0, [#allocation15]  }
  0xd8   :  { %s5105_s30 = smov [#allocation19]   ;;  %s5005_s10 = scalar_lea.hbm %s5203_s4, 16 }
  0xd9   :  { %s205_s19 = sshll.u32 %s5105_s30, 4  ;;  %p5006_p10 = scmp.ne.s32.totalorder %s5203_s4, %s5005_s10  ;;  %s206_s19 = int_to_ptr.vmem [resolvable:$true] %s205_s19 }
  0xda   :  { %p5009_p11 = scmp.lt.u32.totalorder %s5005_s10, %s5203_s4 }
  0xdc   :  { %p5011_p12 = pnand %p5009_p11, %p5006_p10 }
  0xde   :  { %5014 = shalt.err (!%p5011_p12)
}
  0xdf   :  { %s5015_s12 = scalar_lea.vmem %s206_s19, 16  ;;  %s5019_s11 = scalar_lea.vmem %s206_s19, 32 }
  0xe0   :  { %p5016_p13 = scmp.ne.s32.totalorder %s206_s19, %s5015_s12  ;;  %p5020_p0 = scmp.lt.s32.totalorder %s206_s19, %s206_s19 }
  0xe1   :  { %p5021_p1 = scmp.lt.s32.totalorder %s5019_s11, %s5015_s12 }
  0xe3   :  { %p5022_p2 = por %p5021_p1, %p5020_p0 }
  0xe5   :  { %p5023_p3 = pnand %p5022_p2, %p5016_p13 }
  0xe7   :  { %5026 = shalt.err (!%p5023_p3)
}
  0xe8   :  { %208 = dma.hbm_to_vmem [thread:$0]  %s5203_s4, 16, %s206_s19, [#allocation18]  }
  0xe9   :  { %5049 = dma.done.wait [#allocation3], 256  }
  0xea   :  { %5050 = vsyncadd [#allocation3], 4294967040 }
  0xeb   :  { %5051 = dma.done.wait [#allocation6], 512  }
  0xec   :  { %5052 = vsyncadd [#allocation6], 4294966784 }
  0xed   :  { %5053 = dma.done.wait [#allocation9], 512  }
  0xee   :  { %5054 = vsyncadd [#allocation9], 4294966784 }
  0xef   :  { %5055 = dma.done.wait [#allocation12], 320  }
  0xf0   :  { %5056 = vsyncadd [#allocation12], 4294966976 }
  0xf1   :  { %5057 = dma.done.wait [#allocation15], 32  }
  0xf2   :  { %5058 = vsyncadd [#allocation15], 4294967264 }
  0xf3   :  { %5059 = dma.done.wait [#allocation18], 32  }
  0xf4   :  { %5060 = vsyncadd [#allocation18], 4294967264  ;;  %vm326_vm0 = vcmask 130048   ;;  %v272_v0 = vld [vmem:[#allocation8] sm:$0xff]  ;;  %v273_v1 = vld [vmem:[#allocation8 + $0x8] sm:$0xff]  ;;  %vm689_vm1 = vcmask 1043456  }
  0xf5   :  { %v266_v2 = vld [vmem:[#allocation2] sm:$0xff]  ;;  %v4261_v3 = vpack.c.bf16 %v273_v1, %v272_v0  ;;  %v271_v5 = vld [vmem:[#allocation7 + $0x8] sm:$0xff]  ;;  %v268_v11 = vld [vmem:[#allocation5] sm:$0xff]  ;;  %vm682_vm2 = vcmask 31744   ;;  %vm986_vm3 = vcmask 523264   ;;  %vm5107_vm4 = vmmov 0  }
  0xf6   :  { %v270_v4 = vld [vmem:[#allocation7] sm:$0xff]  ;;  %3675 = vmatprep.mubr.msk.f32.mxu0 %vm326_vm0, %v266_v2  ;;  %v323_v7 = vsub.f32 1.0, %v271_v5  ;;  %v267_v9 = vld [vmem:[#allocation2 + $0x8] sm:$0xff]  ;;  %v269_v12 = vld [vmem:[#allocation5 + $0x8] sm:$0xff]  ;;  %s6031_s6 = sld [smem:[#allocation30_spill]]  ;;  %s6032_s4 = sld [smem:[#allocation31_spill]] }
  0xf7   :  { %v322_v6 = vsub.f32 1.0, %v270_v4  ;;  %4262 = vmatprep.subr.bf16.mxu0 %v4261_v3  ;;  %4274 = vmatprep.subr.bf16.mxu1 %v4261_v3  ;;  %v681_v19 = vld [vmem:[#allocation13] sm:$0xf]  ;;  %v679_v22 = vld [vmem:[%s5118_s5] sm:$0xff]  ;;  %v680_v23 = vld [vmem:[%s5118_s5 + $0x8] sm:$0xff]  ;;  %s6023_s5 = sld [smem:[#allocation28_spill]] }
  0xf8   :  { %4264 = vmatpush3.bf16.msra.mxu0 %v4261_v3  ;;  %4276 = vmatpush3.bf16.msra.mxu1 %v4261_v3  ;;  %v325_v10 = vmul.f32 %v323_v7, %v267_v9  ;;  %v350_v35 = vmul.f32 %v323_v7, %v269_v12  ;;  %v5367_v40 = vld [vmem:[%s5143_s25] sm:$0xff]  ;;  %v978_v48 = vld [vmem:[%s5173_s24 + $0x8] sm:$0xff]  ;;  %v979_v53 = vld [vmem:[%s5173_s24 + $0x10] sm:$0xff]  ;;  %s6034_s15 = sld [smem:[#allocation32_spill]]  ;;  %s6035_s16 = sld [smem:[#allocation34_spill]] }
  0xf9   :  { %v324_v8 = vmul.f32 %v322_v6, %v266_v2  ;;  %4266 = vmatprep.subr.bf16.mxu0 %v4261_v3  ;;  %v349_v31 = vmul.f32 %v322_v6, %v268_v11  ;;  %v977_v47 = vld [vmem:[%s5173_s24] sm:$0xff]  ;;  %v980_v54 = vld [vmem:[%s5173_s24 + $0x18] sm:$0xff]  ;;  %v5389_v55 = vld [vmem:[%s5143_s25 + $0x8] sm:$0xff]  ;;  %s6036_s21 = sld [smem:[#allocation35_spill]]  ;;  %s6037_s18 = sld [smem:[#allocation33_spill]] }
  0xfa   :  { %v334_v15 = vmul.f32 %v325_v10, %v269_v12  ;;  %v330_v17 = vsel %vm326_vm0, %v325_v10, 0.0  ;;  %v348_v20 = vadd.f32 %v325_v10, %v271_v5  ;;  %v4313_v52 = vpack.c.bf16 %v978_v48, %v977_v47  ;;  %v5392_v56 = vld [vmem:[%s5143_s25 + $0x10] sm:$0xff]  ;;  %v981_v58 = vld [vmem:[%s5173_s24 + $0x20] sm:$0xff]  ;;  %v982_v59 = vld [vmem:[%s5173_s24 + $0x28] sm:$0xff]  ;;  %s6043_s9 = sld [smem:[#allocation37_spill]]  ;;  %s6045_s22 = sld [smem:[#allocation38_spill]] }
  0xfb   :  { %v327_v13 = vsel %vm326_vm0, %v324_v8, 0.0  ;;  %3676 = vmatmul.mubr.msk.f32.vlgmr.msra.gmra.mrb[0].mxu0 %vm326_vm0, %v267_v9  ;;  %v333_v14 = vmul.f32 %v324_v8, %v268_v11  ;;  %v347_v16 = vadd.f32 %v324_v8, %v270_v4  ;;  %v4317_v57 = vpack.c.bf16 %v980_v54, %v979_v53  ;;  %v5401_v60 = vld [vmem:[%s5143_s25 + $0x18] sm:$0xff]  ;;  %v5404_v61 = vld [vmem:[%s5143_s25 + $0x20] sm:$0xff]  ;;  %v983_v63 = vld [vmem:[%s5173_s24 + $0x30] sm:$0xff]  ;;  %s6046_s17 = sld [smem:[#allocation40_spill]]  ;;  %s6047_s23 = sld [smem:[#allocation39_spill]] }
  0xfc   :  { %328 = vadd.xlane.f32.xlu0 %v327_v13  ;;  %4268 = vmatpush3.bf16.msra.mxu0 %v4261_v3  ;;  %v338_v21 = vsel %vm326_vm0, %v334_v15, 0.0  ;;  %v4321_v62 = vpack.c.bf16 %v982_v59, %v981_v58  ;;  %v984_v0 = vld [vmem:[%s5173_s24 + $0x38] sm:$0xff]  ;;  %v5413_v1 = vld [vmem:[%s5143_s25 + $0x28] sm:$0xff]  ;;  %v5416_v2 = vld [vmem:[%s5143_s25 + $0x30] sm:$0xff]  ;;  %v6004_v13 = vmov 0.0|0.0   ;;  %s6030_s24 = sld [smem:[#allocation29_spill]] }
  0xfd   :  { %3682 = vmatprep.mubr.msk.f32.mxu0 %vm326_vm0, %v268_v11  ;;  %4270 = vmatprep.subr.bf16.mxu0 %v4261_v3  ;;  %v335_v18 = vsel %vm326_vm0, %v333_v14, 0.0  ;;  %v5433_v6 = vld [vmem:[%s5143_s25 + $0x48] sm:$0xff]  ;;  %v5436_v7 = vld [vmem:[%s5143_s25 + $0x50] sm:$0xff]  ;;  %v5443_v8 = vld [vmem:[%s5143_s25 + $0x58] sm:$0xff]  ;;  %s5109_s14 = smov [#allocation20]  }
  0xfe   :  { %336 = vadd.xlane.f32.xlu1 %v335_v18  ;;  %v5446_v9 = vld [vmem:[%s5143_s25 + $0x60] sm:$0xff]  ;;  %v5453_v10 = vld [vmem:[%s5143_s25 + $0x68] sm:$0xff]  ;;  %v5456_v11 = vld [vmem:[%s5143_s25 + $0x70] sm:$0xff]  ;;  %s3170_s0 = sshll.u32 %s5109_s14, 4  ;;  %s3171_s0 = int_to_ptr.vmem [resolvable:$true] %s3170_s0 }
  0xff   :  { %3683 = vmatmul.mubr.msk.f32.vlgmr.msra.gmra.mrb[2].mxu0 %vm326_vm0, %v269_v12  ;;  %v5463_v12 = vld [vmem:[%s5143_s25 + $0x78] sm:$0xff]  ;;  %v5480_v18 = vld [vmem:[%s6023_s5] sm:$0xff]  ;;  %vm5489_vm5 = vmpackc.low %vm986_vm3, %vm986_vm3  ;;  %p5032_p5 = scmp.lt.s32.totalorder %s3171_s0, %s3171_s0 }
 0x100   :  { %331 = vadd.xlane.f32.xlu0 %v330_v17  ;;  %4272 = vmatpush3.bf16.msra.mxu0 %v4261_v3  ;;  %v4325_v3 = vpack.c.bf16 %v984_v0, %v983_v63  ;;  %v5477_v17 = vld [vmem:[%s6023_s5 + $0x8] sm:$0xff]  ;;  %v5527_v53 = vld [vmem:[%s6023_s5 + $0x40] sm:$0xff]  ;;  %v5532_v63 = vld [vmem:[%s6023_s5 + $0x58] sm:$0xff] }
 0x101   :  { %3689 = vmatprep.mubr.msk.f32.mxu0 %vm326_vm0, %v347_v16  ;;  %3699 = vmatprep.subr.msk.mxu0 %vm689_vm1, %v681_v19  ;;  %v6002_v16 = vmov 0.0   ;;  %v5535_v0 = vld [vmem:[%s6023_s5 + $0x50] sm:$0xff] }
 0x102   :  { %339 = vadd.xlane.f32.xlu1 %v338_v21 }
 0x103   :  { %3690 = vmatmul.mubr.msk.f32.vlgmr.msra.gmra.mrb[4].mxu0 %vm326_vm0, %v348_v20 }
 0x104   :  { %3700 = vmatpush3.msk.msra.mxu0 %vm689_vm1, %v681_v19  ;;  %3701 = vmatprep.mubr.msk.f32.mxu0 %vm682_vm2, %v679_v22 }
 0x105   :  { %4281 = vmatprep.subr.bf16.mxu0 %v6004_v13 }
 0x107   :  { %3702 = vmatmul.mubr.msk.f32.vlgmr.msra.gmra.mrb[6].mxu0 %vm682_vm2, %v680_v23  ;;  %v5485_v23 = vld [vmem:[%s6023_s5 + $0x18] sm:$0xff] }
 0x108   :  { %3764 = vmatprep.mubr.msk.f32.mxu0 %vm5107_vm4, %v6002_v16  ;;  %v1393_v16 = vld [vmem:[%s6031_s6 + $0x10] sm:$0xff] }
 0x189   :  { %v329_v24 = vpop.xlane.xlu0 %328 }
 0x18a   :  { %v341_v25 = vmax.f32 %v329_v24, 1.0 }
 0x18b   :  { %v337_v28 = vpop.xlane.xlu1 %336 }
 0x18c   :  { %4754 = vrcp.f32 %v341_v25  ;;  %v5494_v25 = vld [vmem:[%s6023_s5 + $0x10] sm:$0xff] }
 0x18d   :  { %v332_v26 = vpop.xlane.xlu0 %331 }
 0x18e   :  { %v342_v27 = vmax.f32 %v332_v26, 1.0 }
 0x18f   :  { %v340_v32 = vpop.xlane.xlu1 %339 }
 0x190   :  { %4756 = vrcp.f32 %v342_v27 }
 0x196   :  { %v4755_v29 = vpop.eup %4754 }
 0x197   :  { %v344_v30 = vmul.f32 %v4755_v29, %v337_v28 }
 0x199   :  { %v351_v33 = vmul.f32 %v344_v30, %v270_v4  ;;  %v5423_v4 = vld [vmem:[%s5143_s25 + $0x38] sm:$0xff] }
 0x19a   :  { %v4757_v34 = vpop.eup %4756 }
 0x19b   :  { %v346_v36 = vmul.f32 %v4757_v34, %v340_v32  ;;  %v353_v37 = vadd.f32 %v351_v33, %v349_v31  ;;  %v5504_v31 = vld [vmem:[%s6023_s5 + $0x28] sm:$0xff]  ;;  %v5508_v32 = vld [vmem:[%s6023_s5 + $0x20] sm:$0xff] }
 0x19d   :  { %v352_v38 = vmul.f32 %v346_v36, %v271_v5  ;;  %3696 = vmatprep.mubr.msk.f32.mxu1 %vm326_vm0, %v353_v37  ;;  %v5426_v5 = vld [vmem:[%s5143_s25 + $0x40] sm:$0xff] }
 0x19f   :  { %v354_v39 = vadd.f32 %v352_v38, %v350_v35  ;;  %v5513_v38 = vld [vmem:[%s6023_s5 + $0x38] sm:$0xff] }
 0x1a1   :  { %3697 = vmatmul.mubr.msk.f32.vlgmr.msra.gmra.mrb[0].mxu1 %vm326_vm0, %v354_v39  ;;  %v5516_v39 = vld [vmem:[%s6023_s5 + $0x30] sm:$0xff] }
 0x1a2   :  { %3708 = vmatprep.mubr.msk.f32.mxu1 %vm326_vm0, %v5367_v40 }
 0x1ce   :  { %v5372_v41 = vpop.f32.mrb[0].mxu0 }
 0x1cf   :  { %v5374_v42 = vpop.f32.mrb[1].mxu0  ;;  %vm1211_vm8 = vcmp.gt.f32.partialorder %v5372_v41, 0.0 }
 0x1d0   :  { %vm1210_vm9 = vcmp.gt.f32.partialorder %v5374_v42, 0.0 }
 0x1d2   :  { %v5376_v43 = vpop.f32.mrb[2].mxu0 }
 0x1d3   :  { %v5378_v44 = vpop.f32.mrb[3].mxu0 }
 0x1d6   :  { %v5380_v45 = vpop.f32.mrb[4].mxu0 }
 0x1d7   :  { %v5382_v46 = vpop.f32.mrb[5].mxu0  ;;  %vm1874_vm12 = vcmp.gt.f32.partialorder %v5380_v45, 0.0 }
 0x1d8   :  { %vm1873_vm13 = vcmp.gt.f32.partialorder %v5382_v46, 0.0 }
 0x1da   :  { %v3703_v49 = vpop.f32.mrb[6].mxu0 }
 0x1db   :  { %v759_v50 = vpop.f32.mrb[7].mxu0 }
 0x1dc   :  { %v4277_v51 = vpack.c.bf16 %v3703_v49, %v759_v50 }
 0x1de   :  { %4278 = vmatprep.subr.bf16.mxu1 %v4277_v51 }
 0x1df   :  { %4280 = vmatpush3.bf16.msra.mxu1 %v4277_v51 }
 0x1e0   :  { %4314 = vmatprep.subr.bf16.mxu1 %v4313_v52 }
 0x1e2   :  { %3709 = vmatmul.mubr.msk.f32.vlgmr.msra.gmra.mrb[2].mxu1 %vm326_vm0, %v5389_v55 }
 0x1e3   :  { %3711 = vmatprep.mubr.msk.f32.mxu1 %vm326_vm0, %v5392_v56  ;;  %4316 = vmatpush3.bf16.msra.mxu1 %v4313_v52  ;;  %v5523_v52 = vld [vmem:[%s6023_s5 + $0x48] sm:$0xff] }
 0x1e4   :  { %4318 = vmatprep.subr.bf16.mxu1 %v4317_v57 }
 0x1e6   :  { %3712 = vmatmul.mubr.msk.f32.gmra.mrb[4].mxu1 %vm326_vm0, %v5401_v60 }
 0x1e7   :  { %3714 = vmatprep.mubr.msk.f32.mxu1 %vm326_vm0, %v5404_v61  ;;  %4320 = vmatpush3.bf16.msra.mxu1 %v4317_v57 }
 0x1e8   :  { %4322 = vmatprep.subr.bf16.mxu1 %v4321_v62 }
 0x1ea   :  { %3715 = vmatmul.mubr.msk.f32.gmra.mrb[6].mxu1 %vm326_vm0, %v5413_v1 }
 0x1eb   :  { %3717 = vmatprep.mubr.msk.f32.mxu1 %vm326_vm0, %v5416_v2  ;;  %4324 = vmatpush3.bf16.msra.mxu1 %v4321_v62 }
 0x1ec   :  { %4326 = vmatprep.subr.bf16.mxu1 %v4325_v3 }
 0x1ee   :  { %3718 = vmatmul.mubr.msk.f32.gmra.mrb[8].mxu1 %vm326_vm0, %v5423_v4 }
 0x1ef   :  { %3720 = vmatprep.mubr.msk.f32.mxu1 %vm326_vm0, %v5426_v5  ;;  %4328 = vmatpush3.bf16.msra.mxu1 %v4325_v3 }
 0x1f2   :  { %3721 = vmatmul.mubr.msk.f32.gmra.mrb[10].mxu1 %vm326_vm0, %v5433_v6 }
 0x1f3   :  { %3723 = vmatprep.mubr.msk.f32.mxu1 %vm326_vm0, %v5436_v7 }
 0x1f6   :  { %3724 = vmatmul.mubr.msk.f32.gmra.mrb[12].mxu1 %vm326_vm0, %v5443_v8 }
 0x1f7   :  { %3726 = vmatprep.mubr.msk.f32.mxu1 %vm326_vm0, %v5446_v9 }
 0x1fa   :  { %3727 = vmatmul.mubr.msk.f32.gmra.mrb[14].mxu1 %vm326_vm0, %v5453_v10 }
 0x1fb   :  { %3729 = vmatprep.mubr.msk.f32.mxu1 %vm326_vm0, %v5456_v11 }
 0x1fe   :  { %3730 = vmatmul.mubr.msk.f32.gmra.mrb[16].mxu1 %vm326_vm0, %v5463_v12 }
 0x1ff   :  { %3783 = vmatprep.mubr.msk.f32.mxu1 %vm986_vm3, %v759_v50 }
 0x202   :  { %3784 = vmatmul.mubr.msk.f32.vlgmr.msra.gmra.mrb[18].mxu1 %vm986_vm3, %v3703_v49 }
 0x274   :  { %v5470_v14 = vpop.f32.mrb[0].mxu1 }
 0x275   :  { %v5472_v15 = vpop.f32.mrb[1].mxu1 }
 0x2b5   :  { %v3710_v19 = vpop.f32.mrb[2].mxu1 }
 0x2b6   :  { %v962_v20 = vmul.f32 %v3710_v19, %v5477_v17  ;;  %v882_v21 = vpop.f32.mrb[3].mxu1 }
 0x2b7   :  { %v961_v22 = vmul.f32 %v882_v21, %v5480_v18 }
 0x2b9   :  { %v5496_v26 = vpack.c.bf16 %v962_v20, %v961_v22  ;;  %v3713_v27 = vpop.f32.mrb[4].mxu1 }
 0x2ba   :  { %v964_v28 = vmul.f32 %v3713_v27, %v5485_v23  ;;  %v892_v29 = vpop.f32.mrb[5].mxu1  ;;  %v5542_v27 = vld [vmem:[%s6023_s5 + $0x68] sm:$0xff] }
 0x2bb   :  { %4284 = vmatpush3.bf16.xpose.msk.msra.mxu0 %vm5489_vm5, %v5496_v26  ;;  %v963_v30 = vmul.f32 %v892_v29, %v5494_v25  ;;  %6026 = vst [vmem:[#allocation41_spill] sm:$0xff] %v5542_v27 }
 0x2bc   :  { %4285 = vmatprep.subr.bf16.mxu0 %v6004_v13 }
 0x2bd   :  { %v4286_v33 = vpack.c.bf16 %v964_v28, %v963_v30  ;;  %v3716_v34 = vpop.f32.mrb[6].mxu1  ;;  %v5545_v28 = vld [vmem:[%s6023_s5 + $0x60] sm:$0xff] }
 0x2be   :  { %v966_v35 = vmul.f32 %v3716_v34, %v5504_v31  ;;  %v902_v36 = vpop.f32.mrb[7].mxu1  ;;  %6027 = vst [vmem:[#allocation42_spill] sm:$0xff] %v5545_v28 }
 0x2bf   :  { %v965_v37 = vmul.f32 %v902_v36, %v5508_v32 }
 0x2c1   :  { %v4290_v47 = vpack.c.bf16 %v966_v35, %v965_v37  ;;  %v3719_v48 = vpop.f32.mrb[8].mxu1  ;;  %v5551_v37 = vld [vmem:[%s6023_s5 + $0x78] sm:$0xff] }
 0x2c2   :  { %v968_v49 = vmul.f32 %v3719_v48, %v5513_v38  ;;  %v912_v50 = vpop.f32.mrb[9].mxu1  ;;  %6028 = vst [vmem:[#allocation43_spill] sm:$0xff] %v5551_v37  ;;  %v5554_v48 = vld [vmem:[%s6023_s5 + $0x70] sm:$0xff] }
 0x2c3   :  { %4288 = vmatpush3.bf16.xpose.msk.msra.mxu0 %vm5489_vm5, %v4286_v33  ;;  %v967_v51 = vmul.f32 %v912_v50, %v5516_v39  ;;  %6029 = vst [vmem:[#allocation44_spill] sm:$0xff] %v5554_v48 }
 0x2c4   :  { %4289 = vmatprep.subr.bf16.mxu0 %v6004_v13 }
 0x2c5   :  { %v4294_v54 = vpack.c.bf16 %v968_v49, %v967_v51  ;;  %v3722_v57 = vpop.f32.mrb[10].mxu1 }
 0x2c6   :  { %v970_v58 = vmul.f32 %v3722_v57, %v5523_v52  ;;  %v922_v59 = vpop.f32.mrb[11].mxu1 }
 0x2c7   :  { %v969_v62 = vmul.f32 %v922_v59, %v5527_v53 }
 0x2c9   :  { %v4298_v3 = vpack.c.bf16 %v970_v58, %v969_v62  ;;  %v3725_v19 = vpop.f32.mrb[12].mxu1 }
 0x2ca   :  { %v972_v20 = vmul.f32 %v3725_v19, %v5532_v63  ;;  %v932_v21 = vpop.f32.mrb[13].mxu1 }
 0x2cb   :  { %4292 = vmatpush3.bf16.xpose.msk.msra.mxu0 %vm5489_vm5, %v4290_v47  ;;  %v971_v22 = vmul.f32 %v932_v21, %v5535_v0  ;;  %v307_v21 = vld [vmem:[%s6030_s24 + $0x8] sm:$0xff] }
 0x2cc   :  { %4293 = vmatprep.subr.bf16.mxu0 %v6004_v13 }
 0x2cd   :  { %v4302_v29 = vpack.c.bf16 %v972_v20, %v971_v22  ;;  %v3728_v30 = vpop.f32.mrb[14].mxu1  ;;  %v985_v20 = vld [vmem:[#allocation14] sm:$0x1] }
 0x2ce   :  { %v974_v34 = vmul.f32 %v3728_v30, %v5542_v27  ;;  %v942_v35 = vpop.f32.mrb[15].mxu1 }
 0x2cf   :  { %v973_v36 = vmul.f32 %v942_v35, %v5545_v28  ;;  %v313_v35 = vld [vmem:[%s6030_s24 + $0x38] sm:$0xff] }
 0x2d1   :  { %v4306_v49 = vpack.c.bf16 %v974_v34, %v973_v36  ;;  %v3731_v50 = vpop.f32.mrb[16].mxu1  ;;  %v311_v34 = vld [vmem:[%s6030_s24 + $0x28] sm:$0xff] }
 0x2d2   :  { %v976_v51 = vmul.f32 %v3731_v50, %v5551_v37  ;;  %v952_v57 = vpop.f32.mrb[17].mxu1 }
 0x2d3   :  { %4296 = vmatpush3.bf16.xpose.msk.msra.mxu0 %vm5489_vm5, %v4294_v54  ;;  %v975_v58 = vmul.f32 %v952_v57, %v5554_v48  ;;  %v3263_v57 = vld [vmem:[#allocation16] ss:$0 sm:$0xff] }
 0x2d4   :  { %4297 = vmatprep.subr.bf16.mxu0 %v6004_v13 }
 0x2d5   :  { %v4310_v59 = vpack.c.bf16 %v976_v51, %v975_v58  ;;  %v3785_v62 = vpop.f32.mrb[18].mxu1 }
 0x2d6   :  { %v1184_v19 = vpop.f32.mrb[19].mxu1 }
 0x2db   :  { %4300 = vmatpush3.bf16.xpose.msk.msra.mxu0 %vm5489_vm5, %v4298_v3 }
 0x2dc   :  { %4301 = vmatprep.subr.bf16.mxu0 %v6004_v13 }
 0x2e3   :  { %4304 = vmatpush3.bf16.xpose.msk.msra.mxu0 %vm5489_vm5, %v4302_v29 }
 0x2e4   :  { %4305 = vmatprep.subr.bf16.mxu0 %v6004_v13 }
 0x2eb   :  { %4308 = vmatpush3.bf16.xpose.msk.msra.mxu0 %vm5489_vm5, %v4306_v49 }
 0x2ec   :  { %4309 = vmatprep.subr.bf16.mxu0 %v6004_v13 }
 0x2f3   :  { %4312 = vmatpush3.bf16.xpose.msk.msra.mxu0 %vm5489_vm5, %v4310_v59 }
 0x2f4   :  { %4362 = vmatprep.subr.bf16.mxu0 %v5496_v26 }
 0x2fa   :  { %3765 = vmatmul.mubr.msk.f32.vlgmr.msra.gmra.mrb[8].mxu0 %vm986_vm3, %v985_v20 }
 0x2fb   :  { %4364 = vmatpush3.bf16.msra.mxu0 %v5496_v26  ;;  %v306_v26 = vld [vmem:[%s6030_s24] sm:$0xff] }
 0x2fc   :  { %4366 = vmatprep.subr.bf16.mxu0 %v4286_v33  ;;  %v5578_v22 = vpack.c.bf16 %v307_v21, %v306_v26  ;;  %v1201_v26 = vmul.f32 %v5376_v43, %v3263_v57  ;;  %v1200_v21 = vmul.f32 %v3263_v57, %v5378_v44 }
 0x2fe   :  { %4330 = vmatprep.subr.bf16.mxu1 %v5578_v22 }
 0x2ff   :  { %4368 = vmatpush3.bf16.msra.mxu0 %v4286_v33  ;;  %v308_v33 = vld [vmem:[%s6030_s24 + $0x10] sm:$0xff]  ;;  %4332 = vmatpush3.bf16.msra.mxu1 %v5578_v22 }
 0x300   :  { %4370 = vmatprep.subr.bf16.mxu0 %v4290_v47 }
 0x303   :  { %4372 = vmatpush3.bf16.msra.mxu0 %v4290_v47  ;;  %v309_v47 = vld [vmem:[%s6030_s24 + $0x18] sm:$0xff] }
 0x304   :  { %4374 = vmatprep.subr.bf16.mxu0 %v4294_v54  ;;  %v5581_v30 = vpack.c.bf16 %v309_v47, %v308_v33 }
 0x306   :  { %4334 = vmatprep.subr.bf16.mxu1 %v5581_v30 }
 0x307   :  { %4376 = vmatpush3.bf16.msra.mxu0 %v4294_v54  ;;  %v310_v54 = vld [vmem:[%s6030_s24 + $0x20] sm:$0xff]  ;;  %4336 = vmatpush3.bf16.msra.mxu1 %v5581_v30 }
 0x308   :  { %4378 = vmatprep.subr.bf16.mxu0 %v4298_v3 }
 0x30b   :  { %4380 = vmatpush3.bf16.msra.mxu0 %v4298_v3  ;;  %v5588_v3 = vpack.c.bf16 %v311_v34, %v310_v54 }
 0x30c   :  { %4382 = vmatprep.subr.bf16.mxu0 %v4302_v29 }
 0x30d   :  { %4338 = vmatprep.subr.bf16.mxu1 %v5588_v3 }
 0x30e   :  { %4340 = vmatpush3.bf16.msra.mxu1 %v5588_v3 }
 0x30f   :  { %4384 = vmatpush3.bf16.msra.mxu0 %v4302_v29  ;;  %v312_v29 = vld [vmem:[%s6030_s24 + $0x30] sm:$0xff] }
 0x310   :  { %4386 = vmatprep.subr.bf16.mxu0 %v4306_v49  ;;  %v5594_v36 = vpack.c.bf16 %v313_v35, %v312_v29 }
 0x312   :  { %4342 = vmatprep.subr.bf16.mxu1 %v5594_v36 }
 0x313   :  { %4388 = vmatpush3.bf16.msra.mxu0 %v4306_v49  ;;  %4344 = vmatpush3.bf16.msra.mxu1 %v5594_v36  ;;  %v1108_v49 = vlaneseq }
 0x314   :  { %4390 = vmatprep.subr.bf16.mxu0 %v4310_v59 }
 0x315   :  { %v1109_v50 = vshrl.u32 %v1108_v49, 7 }
 0x317   :  { %4392 = vmatpush3.bf16.msra.mxu0 %v4310_v59  ;;  %v5599_v51 = vsub.s32 0, %v1109_v50  ;;  %v315_v50 = vld [vmem:[%s6030_s24 + $0x48] sm:$0xff] }
 0x3cd   :  { %v1104_v58 = vpop.f32.mrb[8].mxu0 }
 0x3ce   :  { %v1111_v59 = vrot.slane %v1104_v58, %v5599_v51  ;;  %v3766_v20 = vpop.f32.mrb[9].mxu0  ;;  %v316_v58 = vld [vmem:[%s6030_s24 + $0x50] sm:$0xff] }
 0x3d0   :  { %v1185_v33 = vadd.f32 %v1184_v19, %v1111_v59  ;;  %v1190_v47 = vadd.f32 %v3785_v62, %v1111_v59  ;;  %v314_v19 = vld [vmem:[%s6030_s24 + $0x40] sm:$0xff]  ;;  %v317_v59 = vld [vmem:[%s6030_s24 + $0x58] sm:$0xff] }
 0x3d1   :  { %v5608_v57 = vpack.c.bf16 %v315_v50, %v314_v19  ;;  %v5614_v20 = vpack.c.bf16 %v317_v59, %v316_v58 }
 0x3d2   :  { %v1202_v54 = vadd.f32 %v1200_v21, %v1185_v33  ;;  %v1203_v34 = vadd.f32 %v1201_v26, %v1190_v47  ;;  %v318_v26 = vld [vmem:[%s6030_s24 + $0x60] sm:$0xff]  ;;  %v319_v21 = vld [vmem:[%s6030_s24 + $0x68] sm:$0xff]  ;;  %v320_v47 = vld [vmem:[%s6030_s24 + $0x70] sm:$0xff] }
 0x3d3   :  { %4346 = vmatprep.subr.bf16.mxu1 %v5608_v57  ;;  %v5618_v33 = vpack.c.bf16 %v319_v21, %v318_v26 }
 0x3d4   :  { %vm1205_vm6 = vcmp.gt.f32.partialorder %v1203_v34, 0.0  ;;  %v1207_v29 = vmul.f32 0.2, %v1203_v34  ;;  %vm1204_vm7 = vcmp.gt.f32.partialorder %v1202_v54, 0.0  ;;  %v1206_v35 = vmul.f32 0.2, %v1202_v54  ;;  %4348 = vmatpush3.bf16.msra.mxu1 %v5608_v57 }
 0x3d5   :  { %4350 = vmatprep.subr.bf16.mxu1 %v5614_v20 }
 0x3d6   :  { %v1209_v49 = vsel %vm1205_vm6, %v1203_v34, %v1207_v29  ;;  %v1208_v43 = vsel %vm1204_vm7, %v1202_v54, %v1206_v35  ;;  %v321_v54 = vld [vmem:[%s6030_s24 + $0x78] sm:$0xff] }
 0x3d7   :  { %v1213_v44 = vsel %vm1211_vm8, %v1209_v49, -1e+30  ;;  %v1212_v62 = vsel %vm1210_vm9, %v1208_v43, -1e+30  ;;  %v5625_v34 = vpack.c.bf16 %v321_v54, %v320_v47  ;;  %v1391_v47 = vld [vmem:[%s6031_s6] sm:$0xff]  ;;  %v1392_v54 = vld [vmem:[%s6031_s6 + $0x8] sm:$0xff] }
 0x3d8   :  { %1216 = vmax.xlane.f32.xlu1 %v1213_v44  ;;  %1214 = vmax.xlane.f32.xlu0 %v1212_v62 }
 0x3d9   :  { %4352 = vmatpush3.bf16.msra.mxu1 %v5614_v20 }
 0x3da   :  { %4354 = vmatprep.subr.bf16.mxu1 %v5618_v33 }
 0x3dd   :  { %4356 = vmatpush3.bf16.msra.mxu1 %v5618_v33 }
 0x3de   :  { %4358 = vmatprep.subr.bf16.mxu1 %v5625_v34 }
 0x3e1   :  { %4360 = vmatpush3.bf16.msra.mxu1 %v5625_v34 }
 0x465   :  { %v1217_v29 = vpop.xlane.xlu1 %1216  ;;  %v1215_v35 = vpop.xlane.xlu0 %1214 }
 0x466   :  { %v1219_v49 = vsub.f32 %v1213_v44, %v1217_v29  ;;  %v1218_v43 = vsub.f32 %v1212_v62, %v1215_v35  ;;  %v4393_v44 = vpack.c.bf16 %v1392_v54, %v1391_v47  ;;  %v1394_v29 = vld [vmem:[%s6031_s6 + $0x18] sm:$0xff]  ;;  %v1395_v35 = vld [vmem:[%s6031_s6 + $0x20] sm:$0xff]  ;;  %v1397_v54 = vld [vmem:[%s6031_s6 + $0x30] sm:$0xff] }
 0x467   :  { %v4397_v62 = vpack.c.bf16 %v1394_v29, %v1393_v16 }
 0x468   :  { %v1222_v19 = vmul.f32 1.442695, %v1219_v49  ;;  %v1220_v50 = vmul.f32 1.442695, %v1218_v43  ;;  %v1396_v49 = vld [vmem:[%s6031_s6 + $0x28] sm:$0xff]  ;;  %4394 = vmatprep.subr.bf16.mxu1 %v4393_v44 }
 0x469   :  { %v4401_v43 = vpack.c.bf16 %v1396_v49, %v1395_v35  ;;  %v1642_v35 = vld [vmem:[%s6032_s4 + $0x8] sm:$0xff]  ;;  %v1643_v49 = vld [vmem:[%s6032_s4 + $0x10] sm:$0xff] }
 0x46a   :  { %4758 = vpow2.f32 %v1222_v19 }
 0x46b   :  { %4760 = vpow2.f32 %v1220_v50 }
 0x474   :  { %v4759_v58 = vpop.eup %4758 }
 0x475   :  { %v4761_v59 = vpop.eup %4760  ;;  %v1225_v26 = vmul.f32 %v4759_v58, %v5372_v41 }
 0x476   :  { %v1224_v21 = vmul.f32 %v4761_v59, %v5374_v42 }
 0x478   :  { %3818 = vmatprep.mubr.f32.mxu1 %v1224_v21 }
 0x479   :  { %3819 = vmatmul.mubr.f32.vlgmr.msra.gmra.mrb[20].mxu1 %v1225_v26 }
 0x47a   :  { %4396 = vmatpush3.bf16.msra.mxu1 %v4393_v44  ;;  %v1398_v44 = vld [vmem:[%s6031_s6 + $0x38] sm:$0xff] }
 0x47b   :  { %4398 = vmatprep.subr.bf16.mxu1 %v4397_v62  ;;  %v4405_v29 = vpack.c.bf16 %v1398_v44, %v1397_v54 }
 0x47e   :  { %4400 = vmatpush3.bf16.msra.mxu1 %v4397_v62  ;;  %v1641_v62 = vld [vmem:[%s6032_s4] sm:$0xff] }
 0x47f   :  { %4402 = vmatprep.subr.bf16.mxu1 %v4401_v43 }
 0x482   :  { %4404 = vmatpush3.bf16.msra.mxu1 %v4401_v43  ;;  %v4445_v43 = vpack.c.bf16 %v1642_v35, %v1641_v62 }
 0x483   :  { %4406 = vmatprep.subr.bf16.mxu1 %v4405_v29 }
 0x484   :  { %4446 = vmatprep.subr.bf16.mxu0 %v4445_v43 }
 0x486   :  { %4408 = vmatpush3.bf16.msra.mxu1 %v4405_v29 }
 0x54c   :  { %v3820_v41 = vpop.f32.mrb[20].mxu1 }
 0x54d   :  { %v1302_v42 = vmax.f32 %v3820_v41, 1e-20  ;;  %v1292_v19 = vpop.f32.mrb[21].mxu1  ;;  %v1644_v41 = vld [vmem:[%s6032_s4 + $0x18] sm:$0xff] }
 0x54e   :  { %v1301_v50 = vmax.f32 %v1292_v19, 1e-20  ;;  %v1645_v19 = vld [vmem:[%s6032_s4 + $0x20] sm:$0xff] }
 0x54f   :  { %4762 = vrcp.f32 %v1302_v42  ;;  %v4449_v42 = vpack.c.bf16 %v1644_v41, %v1643_v49 }
 0x550   :  { %4764 = vrcp.f32 %v1301_v50  ;;  %v1646_v50 = vld [vmem:[%s6032_s4 + $0x28] sm:$0xff] }
 0x559   :  { %v4763_v16 = vpop.eup %4762 }
 0x55a   :  { %v4765_v58 = vpop.eup %4764  ;;  %v1306_v47 = vmul.f32 %v4763_v16, %v1225_v26  ;;  %v4453_v26 = vpack.c.bf16 %v1646_v50, %v1645_v19  ;;  %v1648_v16 = vld [vmem:[%s6032_s4 + $0x38] sm:$0xff] }
 0x55b   :  { %v1304_v59 = vmul.f32 %v4765_v58, %v1224_v21  ;;  %v1647_v21 = vld [vmem:[%s6032_s4 + $0x30] sm:$0xff] }
 0x55c   :  { %v4457_v58 = vpack.c.bf16 %v1648_v16, %v1647_v21 }
 0x55d   :  { %3853 = vmatprep.mubr.f32.mxu0 %v1304_v59  ;;  %v3264_v59 = vld [vmem:[#allocation17] ss:$0 sm:$0xff] }
 0x55e   :  { %3854 = vmatmul.mubr.f32.vlgmr.msra.gmra.mrb[10].mxu0 %v1306_v47 }
 0x55f   :  { %4448 = vmatpush3.bf16.msra.mxu0 %v4445_v43 }
 0x560   :  { %4450 = vmatprep.subr.bf16.mxu0 %v4449_v42 }
 0x563   :  { %4452 = vmatpush3.bf16.msra.mxu0 %v4449_v42 }
 0x564   :  { %4454 = vmatprep.subr.bf16.mxu0 %v4453_v26 }
 0x567   :  { %4456 = vmatpush3.bf16.msra.mxu0 %v4453_v26 }
 0x568   :  { %4458 = vmatprep.subr.bf16.mxu0 %v4457_v58 }
 0x56b   :  { %4460 = vmatpush3.bf16.msra.mxu0 %v4457_v58 }
 0x56c   :  { %4462 = vmatprep.subr.bf16.mxu0 %v5578_v22 }
 0x631   :  { %v3855_v47 = vpop.f32.mrb[10].mxu0 }
 0x632   :  { %v1386_v54 = vadd.f32 %v3855_v47, %v3264_v59  ;;  %v1380_v44 = vpop.f32.mrb[11].mxu0 }
 0x633   :  { %v1381_v29 = vadd.f32 %v3264_v59, %v1380_v44 }
 0x634   :  { %v1390_v35 = vmax.f32 %v1386_v54, 0.0 }
 0x635   :  { %v1389_v62 = vmax.f32 %v1381_v29, 0.0 }
 0x637   :  { %3872 = vmatprep.mubr.msk.f32.mxu1 %vm986_vm3, %v1389_v62 }
 0x638   :  { %3873 = vmatmul.mubr.msk.f32.vlgmr.msra.gmra.mrb[22].mxu1 %vm986_vm3, %v1390_v35 }
 0x639   :  { %3879 = vmatprep.mubr.msk.f32.mxu1 %vm326_vm0, %v5367_v40  ;;  %v6033_v40 = vmov 0.0  }
 0x70b   :  { %v3874_v49 = vpop.f32.mrb[22].mxu1 }
 0x70c   :  { %v1471_v43 = vpop.f32.mrb[23].mxu1 }
 0x70d   :  { %v4409_v41 = vpack.c.bf16 %v3874_v49, %v1471_v43  ;;  %3954 = vmatprep.mubr.msk.f32.mxu0 %vm986_vm3, %v1471_v43 }
 0x70e   :  { %3955 = vmatmul.mubr.msk.f32.vlgmr.msra.gmra.mrb[12].mxu0 %vm986_vm3, %v3874_v49 }
 0x70f   :  { %4410 = vmatprep.subr.bf16.mxu1 %v4409_v41  ;;  %4464 = vmatpush3.bf16.msra.mxu0 %v5578_v22 }
 0x710   :  { %4412 = vmatpush3.bf16.msra.mxu1 %v4409_v41  ;;  %4466 = vmatprep.subr.bf16.mxu0 %v5581_v30 }
 0x711   :  { %4413 = vmatprep.subr.bf16.mxu1 %v6004_v13 }
 0x713   :  { %3880 = vmatmul.mubr.msk.f32.vlgmr.msra.gmra.mrb[24].mxu1 %vm326_vm0, %v5389_v55  ;;  %4468 = vmatpush3.bf16.msra.mxu0 %v5581_v30 }
 0x714   :  { %3882 = vmatprep.mubr.msk.f32.mxu1 %vm326_vm0, %v5392_v56  ;;  %4470 = vmatprep.subr.bf16.mxu0 %v5588_v3 }
 0x717   :  { %3883 = vmatmul.mubr.msk.f32.gmra.mrb[26].mxu1 %vm326_vm0, %v5401_v60  ;;  %4472 = vmatpush3.bf16.msra.mxu0 %v5588_v3 }
 0x718   :  { %3885 = vmatprep.mubr.msk.f32.mxu1 %vm326_vm0, %v5404_v61  ;;  %4474 = vmatprep.subr.bf16.mxu0 %v5594_v36 }
 0x71b   :  { %3886 = vmatmul.mubr.msk.f32.gmra.mrb[28].mxu1 %vm326_vm0, %v5413_v1  ;;  %4476 = vmatpush3.bf16.msra.mxu0 %v5594_v36 }
 0x71c   :  { %3888 = vmatprep.mubr.msk.f32.mxu1 %vm326_vm0, %v5416_v2  ;;  %4478 = vmatprep.subr.bf16.mxu0 %v5608_v57 }
 0x71f   :  { %3889 = vmatmul.mubr.msk.f32.gmra.mrb[30].mxu1 %vm326_vm0, %v5423_v4  ;;  %4480 = vmatpush3.bf16.msra.mxu0 %v5608_v57 }
 0x720   :  { %3891 = vmatprep.mubr.msk.f32.mxu1 %vm326_vm0, %v5426_v5  ;;  %4482 = vmatprep.subr.bf16.mxu0 %v5614_v20 }
 0x723   :  { %3892 = vmatmul.mubr.msk.f32.gmra.mrb[32].mxu1 %vm326_vm0, %v5433_v6  ;;  %4484 = vmatpush3.bf16.msra.mxu0 %v5614_v20 }
 0x724   :  { %3894 = vmatprep.mubr.msk.f32.mxu1 %vm326_vm0, %v5436_v7  ;;  %4486 = vmatprep.subr.bf16.mxu0 %v5618_v33 }
 0x727   :  { %3895 = vmatmul.mubr.msk.f32.gmra.mrb[34].mxu1 %vm326_vm0, %v5443_v8  ;;  %4488 = vmatpush3.bf16.msra.mxu0 %v5618_v33 }
 0x728   :  { %3897 = vmatprep.mubr.msk.f32.mxu1 %vm326_vm0, %v5446_v9  ;;  %4490 = vmatprep.subr.bf16.mxu0 %v5625_v34 }
 0x72b   :  { %3898 = vmatmul.mubr.msk.f32.gmra.mrb[36].mxu1 %vm326_vm0, %v5453_v10  ;;  %4492 = vmatpush3.bf16.msra.mxu0 %v5625_v34 }
 0x72c   :  { %3900 = vmatprep.mubr.msk.f32.mxu1 %vm326_vm0, %v5456_v11 }
 0x72f   :  { %3901 = vmatmul.mubr.msk.f32.gmra.mrb[38].mxu1 %vm326_vm0, %v5463_v12 }
 0x730   :  { %3935 = vmatprep.mubr.msk.f32.mxu1 %vm5107_vm4, %v6033_v40 }
 0x7e1   :  { %v5703_v55 = vpop.f32.mrb[12].mxu0 }
 0x7e2   :  { %v5705_v56 = vpop.f32.mrb[13].mxu0 }
 0x7e6   :  { %v3881_v42 = vpop.f32.mrb[24].mxu1 }
 0x7e7   :  { %v1626_v19 = vmul.f32 %v3881_v42, %v5477_v17  ;;  %v1546_v50 = vpop.f32.mrb[25].mxu1 }
 0x7e8   :  { %v1625_v26 = vmul.f32 %v1546_v50, %v5480_v18 }
 0x7ea   :  { %v5709_v21 = vpack.c.bf16 %v1626_v19, %v1625_v26  ;;  %v3884_v16 = vpop.f32.mrb[26].mxu1 }
 0x7eb   :  { %v1628_v58 = vmul.f32 %v3884_v16, %v5485_v23  ;;  %v1556_v59 = vpop.f32.mrb[27].mxu1 }
 0x7ec   :  { %4416 = vmatpush3.bf16.xpose.msk.msra.mxu1 %vm5489_vm5, %v5709_v21  ;;  %4494 = vmatprep.subr.bf16.mxu0 %v5709_v21  ;;  %v1627_v47 = vmul.f32 %v1556_v59, %v5494_v25 }
 0x7ed   :  { %4417 = vmatprep.subr.bf16.mxu1 %v6004_v13 }
 0x7ee   :  { %v5718_v54 = vpack.c.bf16 %v1628_v58, %v1627_v47  ;;  %v3887_v44 = vpop.f32.mrb[28].mxu1 }
 0x7ef   :  { %v1630_v29 = vmul.f32 %v3887_v44, %v5504_v31  ;;  %v1566_v62 = vpop.f32.mrb[29].mxu1 }
 0x7f0   :  { %v1629_v35 = vmul.f32 %v1566_v62, %v5508_v32 }
 0x7f2   :  { %v5722_v49 = vpack.c.bf16 %v1630_v29, %v1629_v35  ;;  %v3890_v43 = vpop.f32.mrb[30].mxu1 }
 0x7f3   :  { %v1632_v41 = vmul.f32 %v3890_v43, %v5513_v38  ;;  %v1576_v42 = vpop.f32.mrb[31].mxu1 }
 0x7f4   :  { %4420 = vmatpush3.bf16.xpose.msk.msra.mxu1 %vm5489_vm5, %v5718_v54  ;;  %v1631_v19 = vmul.f32 %v1576_v42, %v5516_v39 }
 0x7f5   :  { %4421 = vmatprep.subr.bf16.mxu1 %v6004_v13 }
 0x7f6   :  { %v5730_v50 = vpack.c.bf16 %v1632_v41, %v1631_v19  ;;  %v3893_v26 = vpop.f32.mrb[32].mxu1 }
 0x7f7   :  { %v1634_v16 = vmul.f32 %v3893_v26, %v5523_v52  ;;  %v1586_v58 = vpop.f32.mrb[33].mxu1 }
 0x7f8   :  { %v1633_v59 = vmul.f32 %v1586_v58, %v5527_v53 }
 0x7fa   :  { %v5734_v47 = vpack.c.bf16 %v1634_v16, %v1633_v59  ;;  %v3896_v44 = vpop.f32.mrb[34].mxu1 }
 0x7fb   :  { %v1636_v29 = vmul.f32 %v3896_v44, %v5532_v63  ;;  %v1596_v62 = vpop.f32.mrb[35].mxu1 }
 0x7fc   :  { %4424 = vmatpush3.bf16.xpose.msk.msra.mxu1 %vm5489_vm5, %v5722_v49  ;;  %v1635_v35 = vmul.f32 %v1596_v62, %v5535_v0 }
 0x7fd   :  { %4425 = vmatprep.subr.bf16.mxu1 %v6004_v13 }
 0x7fe   :  { %v5742_v43 = vpack.c.bf16 %v1636_v29, %v1635_v35  ;;  %v3899_v41 = vpop.f32.mrb[36].mxu1  ;;  %v1649_v35 = vld [vmem:[#allocation19] sm:$0x1] }
 0x7ff   :  { %v1638_v42 = vmul.f32 %v3899_v41, %v5542_v27  ;;  %v1606_v19 = vpop.f32.mrb[37].mxu1  ;;  %v3302_v41 = vld [vmem:[%s6034_s15] ss:$0 sm:$0xff] }
 0x800   :  { %v1637_v26 = vmul.f32 %v1606_v19, %v5545_v28 }
 0x802   :  { %v5746_v16 = vpack.c.bf16 %v1638_v42, %v1637_v26  ;;  %v3902_v58 = vpop.f32.mrb[38].mxu1 }
 0x803   :  { %v1640_v59 = vmul.f32 %v3902_v58, %v5551_v37  ;;  %v1616_v44 = vpop.f32.mrb[39].mxu1  ;;  %v1864_v58 = vmul.f32 %v5470_v14, %v3302_v41 }
 0x804   :  { %4428 = vmatpush3.bf16.xpose.msk.msra.mxu1 %vm5489_vm5, %v5730_v50  ;;  %v1639_v29 = vmul.f32 %v1616_v44, %v5554_v48 }
 0x805   :  { %4429 = vmatprep.subr.bf16.mxu1 %v6004_v13 }
 0x806   :  { %v4442_v62 = vpack.c.bf16 %v1640_v59, %v1639_v29  ;;  %v1863_v59 = vmul.f32 %v3302_v41, %v5472_v15 }
 0x80c   :  { %4432 = vmatpush3.bf16.xpose.msk.msra.mxu1 %vm5489_vm5, %v5734_v47 }
 0x80d   :  { %4433 = vmatprep.subr.bf16.mxu1 %v6004_v13 }
 0x814   :  { %4436 = vmatpush3.bf16.xpose.msk.msra.mxu1 %vm5489_vm5, %v5742_v43 }
 0x815   :  { %4437 = vmatprep.subr.bf16.mxu1 %v6004_v13 }
 0x81c   :  { %4440 = vmatpush3.bf16.xpose.msk.msra.mxu1 %vm5489_vm5, %v5746_v16 }
 0x81d   :  { %4441 = vmatprep.subr.bf16.mxu1 %v6004_v13 }
 0x824   :  { %4444 = vmatpush3.bf16.xpose.msk.msra.mxu1 %vm5489_vm5, %v4442_v62 }
 0x82b   :  { %3936 = vmatmul.mubr.msk.f32.vlgmr.msra.gmra.mrb[40].mxu1 %vm986_vm3, %v1649_v35 }
 0x8fe   :  { %v1767_v42 = vpop.f32.mrb[40].mxu1 }
 0x8ff   :  { %v1774_v19 = vrot.slane %v1767_v42, %v5599_v51  ;;  %v3937_v26 = vpop.f32.mrb[41].mxu1 }
 0x901   :  { %v1848_v44 = vadd.f32 %v5705_v56, %v1774_v19  ;;  %v1853_v29 = vadd.f32 %v5703_v55, %v1774_v19 }
 0x903   :  { %v1865_v13 = vadd.f32 %v1863_v59, %v1848_v44  ;;  %v1866_v48 = vadd.f32 %v1864_v58, %v1853_v29  ;;  %v2058_v29 = vld [vmem:[%s6035_s16 + $0x20] sm:$0xff] }
 0x905   :  { %vm1868_vm10 = vcmp.gt.f32.partialorder %v1866_v48, 0.0  ;;  %v1870_v37 = vmul.f32 0.2, %v1866_v48  ;;  %vm1867_vm11 = vcmp.gt.f32.partialorder %v1865_v13, 0.0  ;;  %v1869_v28 = vmul.f32 0.2, %v1865_v13 }
 0x907   :  { %v1872_v35 = vsel %vm1868_vm10, %v1866_v48, %v1870_v37  ;;  %v1871_v27 = vsel %vm1867_vm11, %v1865_v13, %v1869_v28 }
 0x908   :  { %v1876_v42 = vsel %vm1874_vm12, %v1872_v35, -1e+30  ;;  %v1875_v56 = vsel %vm1873_vm13, %v1871_v27, -1e+30  ;;  %v2054_v27 = vld [vmem:[%s6035_s16] sm:$0xff]  ;;  %v2059_v35 = vld [vmem:[%s6035_s16 + $0x28] sm:$0xff] }
 0x909   :  { %1879 = vmax.xlane.f32.xlu1 %v1876_v42  ;;  %1877 = vmax.xlane.f32.xlu0 %v1875_v56 }
 0x996   :  { %v1880_v55 = vpop.xlane.xlu1 %1879  ;;  %v1878_v41 = vpop.xlane.xlu0 %1877 }
 0x997   :  { %v1882_v19 = vsub.f32 %v1876_v42, %v1880_v55  ;;  %v1881_v26 = vsub.f32 %v1875_v56, %v1878_v41 }
 0x999   :  { %v1885_v58 = vmul.f32 1.442695, %v1882_v19  ;;  %v1883_v59 = vmul.f32 1.442695, %v1881_v26  ;;  %v2060_v26 = vld [vmem:[%s6035_s16 + $0x30] sm:$0xff] }
 0x99b   :  { %4766 = vpow2.f32 %v1885_v58  ;;  %v2061_v58 = vld [vmem:[%s6035_s16 + $0x38] sm:$0xff] }
 0x99c   :  { %4768 = vpow2.f32 %v1883_v59  ;;  %v4537_v59 = vpack.c.bf16 %v2061_v58, %v2060_v26 }
 0x9a5   :  { %v4767_v37 = vpop.eup %4766 }
 0x9a6   :  { %v4769_v13 = vpop.eup %4768  ;;  %v1888_v28 = vmul.f32 %v4767_v37, %v5380_v45  ;;  %v2304_v37 = vld [vmem:[%s6036_s21] sm:$0xff] }
 0x9a7   :  { %v1887_v48 = vmul.f32 %v4769_v13, %v5382_v46  ;;  %v2305_v13 = vld [vmem:[%s6036_s21 + $0x8] sm:$0xff] }
 0x9a9   :  { %3989 = vmatprep.mubr.f32.mxu0 %v1887_v48 }
 0x9aa   :  { %3990 = vmatmul.mubr.f32.vlgmr.msra.gmra.mrb[14].mxu0 %v1888_v28 }
 0x9ab   :  { %4496 = vmatpush3.bf16.msra.mxu0 %v5709_v21  ;;  %v2055_v21 = vld [vmem:[%s6035_s16 + $0x8] sm:$0xff] }
 0x9ac   :  { %4498 = vmatprep.subr.bf16.mxu0 %v5718_v54 }
 0x9af   :  { %4500 = vmatpush3.bf16.msra.mxu0 %v5718_v54  ;;  %v2056_v54 = vld [vmem:[%s6035_s16 + $0x10] sm:$0xff] }
 0x9b0   :  { %4502 = vmatprep.subr.bf16.mxu0 %v5722_v49 }
 0x9b3   :  { %4504 = vmatpush3.bf16.msra.mxu0 %v5722_v49  ;;  %v4525_v49 = vpack.c.bf16 %v2055_v21, %v2054_v27  ;;  %v2306_v27 = vld [vmem:[%s6036_s21 + $0x10] sm:$0xff]  ;;  %v4577_v21 = vpack.c.bf16 %v2305_v13, %v2304_v37  ;;  %v4783_v37 = vld [vmem:[%s5143_s25 + $0x8] sm:$0xff] }
 0x9b4   :  { %4506 = vmatprep.subr.bf16.mxu0 %v5730_v50  ;;  %v4784_v13 = vld [vmem:[%s5143_s25 + $0x10] sm:$0xff] }
 0x9b5   :  { %4526 = vmatprep.subr.bf16.mxu1 %v4525_v49 }
 0x9b6   :  { %4528 = vmatpush3.bf16.msra.mxu1 %v4525_v49 }
 0x9b7   :  { %4508 = vmatpush3.bf16.msra.mxu0 %v5730_v50  ;;  %v2057_v50 = vld [vmem:[%s6035_s16 + $0x18] sm:$0xff] }
 0x9b8   :  { %4510 = vmatprep.subr.bf16.mxu0 %v5734_v47  ;;  %v4529_v44 = vpack.c.bf16 %v2057_v50, %v2056_v54  ;;  %v2307_v54 = vld [vmem:[%s6036_s21 + $0x18] sm:$0xff]  ;;  %v2308_v50 = vld [vmem:[%s6036_s21 + $0x20] sm:$0xff] }
 0x9b9   :  { %v4581_v49 = vpack.c.bf16 %v2307_v54, %v2306_v27  ;;  %v6039_v54 = vld [vmem:[#allocation41_spill] sm:$0xff] }
 0x9ba   :  { %4530 = vmatprep.subr.bf16.mxu1 %v4529_v44 }
 0x9bb   :  { %4512 = vmatpush3.bf16.msra.mxu0 %v5734_v47  ;;  %v4533_v47 = vpack.c.bf16 %v2059_v35, %v2058_v29  ;;  %4532 = vmatpush3.bf16.msra.mxu1 %v4529_v44  ;;  %v2310_v44 = vld [vmem:[%s6036_s21 + $0x30] sm:$0xff]  ;;  %v2311_v29 = vld [vmem:[%s6036_s21 + $0x38] sm:$0xff] }
 0x9bc   :  { %4514 = vmatprep.subr.bf16.mxu0 %v5742_v43  ;;  %v4589_v35 = vpack.c.bf16 %v2311_v29, %v2310_v44  ;;  %v6042_v44 = vld [vmem:[#allocation43_spill] sm:$0xff] }
 0x9bd   :  { %4534 = vmatprep.subr.bf16.mxu1 %v4533_v47 }
 0x9bf   :  { %4516 = vmatpush3.bf16.msra.mxu0 %v5742_v43  ;;  %4536 = vmatpush3.bf16.msra.mxu1 %v4533_v47  ;;  %v3303_v47 = vld [vmem:[%s6037_s18] ss:$0 sm:$0xff] }
 0x9c0   :  { %4518 = vmatprep.subr.bf16.mxu0 %v5746_v16  ;;  %4538 = vmatprep.subr.bf16.mxu1 %v4537_v59 }
 0x9c3   :  { %4520 = vmatpush3.bf16.msra.mxu0 %v5746_v16  ;;  %4540 = vmatpush3.bf16.msra.mxu1 %v4537_v59  ;;  %v6038_v59 = vmov 0.0|0.0  }
 0x9c4   :  { %4522 = vmatprep.subr.bf16.mxu0 %v4442_v62 }
 0x9c7   :  { %4524 = vmatpush3.bf16.msra.mxu0 %v4442_v62 }
 0x9c8   :  { %4578 = vmatprep.subr.bf16.mxu0 %v4577_v21 }
 0xa7d   :  { %v3991_v43 = vpop.f32.mrb[14].mxu0 }
 0xa7e   :  { %v1965_v16 = vmax.f32 %v3991_v43, 1e-20  ;;  %v1955_v62 = vpop.f32.mrb[15].mxu0 }
 0xa7f   :  { %v1964_v42 = vmax.f32 %v1955_v62, 1e-20 }
 0xa80   :  { %4770 = vrcp.f32 %v1965_v16 }
 0xa81   :  { %4772 = vrcp.f32 %v1964_v42 }
 0xa8a   :  { %v4771_v56 = vpop.eup %4770 }
 0xa8b   :  { %v4773_v55 = vpop.eup %4772  ;;  %v1969_v19 = vmul.f32 %v4771_v56, %v1888_v28 }
 0xa8c   :  { %v1967_v41 = vmul.f32 %v4773_v55, %v1887_v48  ;;  %v2309_v48 = vld [vmem:[%s6036_s21 + $0x28] sm:$0xff] }
 0xa8d   :  { %v4585_v28 = vpack.c.bf16 %v2309_v48, %v2308_v50  ;;  %v6040_v50 = vld [vmem:[#allocation42_spill] sm:$0xff] }
 0xa8e   :  { %4024 = vmatprep.mubr.f32.mxu0 %v1967_v41  ;;  %v4782_v41 = vld [vmem:[%s5143_s25] sm:$0xff]  ;;  %s6041_s25 = sld [smem:[#allocation36_spill]] }
 0xa8f   :  { %4025 = vmatmul.mubr.f32.vlgmr.msra.gmra.mrb[16].mxu0 %v1969_v19 }
 0xa90   :  { %4580 = vmatpush3.bf16.msra.mxu0 %v4577_v21 }
 0xa91   :  { %4582 = vmatprep.subr.bf16.mxu0 %v4581_v49 }
 0xa94   :  { %4584 = vmatpush3.bf16.msra.mxu0 %v4581_v49 }
 0xa95   :  { %4586 = vmatprep.subr.bf16.mxu0 %v4585_v28 }
 0xa98   :  { %4588 = vmatpush3.bf16.msra.mxu0 %v4585_v28 }
 0xa99   :  { %4590 = vmatprep.subr.bf16.mxu0 %v4589_v35 }
 0xa9c   :  { %4592 = vmatpush3.bf16.msra.mxu0 %v4589_v35 }
 0xa9d   :  { %4594 = vmatprep.subr.bf16.mxu0 %v5578_v22 }
 0xb62   :  { %v4026_v43 = vpop.f32.mrb[16].mxu0 }
 0xb63   :  { %v2049_v16 = vadd.f32 %v4026_v43, %v3303_v47  ;;  %v2043_v62 = vpop.f32.mrb[17].mxu0 }
 0xb64   :  { %v2044_v42 = vadd.f32 %v3303_v47, %v2043_v62  ;;  %v3341_v62 = vld [vmem:[%s6043_s9] ss:$0 sm:$0xff] }
 0xb65   :  { %v2053_v55 = vmax.f32 %v2049_v16, 0.0  ;;  %v2312_v16 = vld [vmem:[%s6041_s25] sm:$0x1] }
 0xb66   :  { %v2052_v56 = vmax.f32 %v2044_v42, 0.0 }
 0xb68   :  { %4043 = vmatprep.mubr.msk.f32.mxu1 %vm986_vm3, %v2052_v56 }
 0xb69   :  { %4044 = vmatmul.mubr.msk.f32.vlgmr.msra.gmra.mrb[42].mxu1 %vm986_vm3, %v2053_v55 }
 0xb6a   :  { %4050 = vmatprep.mubr.msk.f32.mxu1 %vm326_vm0, %v4782_v41  ;;  %v2527_v41 = vmul.f32 %v5470_v14, %v3341_v62 }
 0xc3c   :  { %v4045_v19 = vpop.f32.mrb[42].mxu1 }
 0xc3d   :  { %v2134_v26 = vpop.f32.mrb[43].mxu1 }
 0xc3e   :  { %v4541_v58 = vpack.c.bf16 %v4045_v19, %v2134_v26  ;;  %4125 = vmatprep.mubr.msk.f32.mxu0 %vm986_vm3, %v2134_v26 }
 0xc3f   :  { %4126 = vmatmul.mubr.msk.f32.vlgmr.msra.gmra.mrb[18].mxu0 %vm986_vm3, %v4045_v19  ;;  %v2526_v19 = vmul.f32 %v3341_v62, %v5472_v15 }
 0xc40   :  { %4542 = vmatprep.subr.bf16.mxu1 %v4541_v58  ;;  %4596 = vmatpush3.bf16.msra.mxu0 %v5578_v22 }
 0xc41   :  { %4544 = vmatpush3.bf16.msra.mxu1 %v4541_v58  ;;  %4598 = vmatprep.subr.bf16.mxu0 %v5581_v30 }
 0xc42   :  { %4545 = vmatprep.subr.bf16.mxu1 %v6038_v59 }
 0xc44   :  { %4051 = vmatmul.mubr.msk.f32.vlgmr.msra.gmra.mrb[44].mxu1 %vm326_vm0, %v4783_v37  ;;  %4600 = vmatpush3.bf16.msra.mxu0 %v5581_v30 }
 0xc45   :  { %4053 = vmatprep.mubr.msk.f32.mxu1 %vm326_vm0, %v4784_v13  ;;  %4602 = vmatprep.subr.bf16.mxu0 %v5588_v3 }
 0xc48   :  { %4054 = vmatmul.mubr.msk.f32.gmra.mrb[46].mxu1 %vm326_vm0, %v5401_v60  ;;  %4604 = vmatpush3.bf16.msra.mxu0 %v5588_v3 }
 0xc49   :  { %4056 = vmatprep.mubr.msk.f32.mxu1 %vm326_vm0, %v5404_v61  ;;  %4606 = vmatprep.subr.bf16.mxu0 %v5594_v36 }
 0xc4c   :  { %4057 = vmatmul.mubr.msk.f32.gmra.mrb[48].mxu1 %vm326_vm0, %v5413_v1  ;;  %4608 = vmatpush3.bf16.msra.mxu0 %v5594_v36 }
 0xc4d   :  { %4059 = vmatprep.mubr.msk.f32.mxu1 %vm326_vm0, %v5416_v2  ;;  %4610 = vmatprep.subr.bf16.mxu0 %v5608_v57 }
 0xc50   :  { %4060 = vmatmul.mubr.msk.f32.gmra.mrb[50].mxu1 %vm326_vm0, %v5423_v4  ;;  %4612 = vmatpush3.bf16.msra.mxu0 %v5608_v57 }
 0xc51   :  { %4062 = vmatprep.mubr.msk.f32.mxu1 %vm326_vm0, %v5426_v5  ;;  %4614 = vmatprep.subr.bf16.mxu0 %v5614_v20 }
 0xc54   :  { %4063 = vmatmul.mubr.msk.f32.gmra.mrb[52].mxu1 %vm326_vm0, %v5433_v6  ;;  %4616 = vmatpush3.bf16.msra.mxu0 %v5614_v20 }
 0xc55   :  { %4065 = vmatprep.mubr.msk.f32.mxu1 %vm326_vm0, %v5436_v7  ;;  %4618 = vmatprep.subr.bf16.mxu0 %v5618_v33 }
 0xc58   :  { %4066 = vmatmul.mubr.msk.f32.gmra.mrb[54].mxu1 %vm326_vm0, %v5443_v8  ;;  %4620 = vmatpush3.bf16.msra.mxu0 %v5618_v33 }
 0xc59   :  { %4068 = vmatprep.mubr.msk.f32.mxu1 %vm326_vm0, %v5446_v9  ;;  %4622 = vmatprep.subr.bf16.mxu0 %v5625_v34 }
 0xc5c   :  { %4069 = vmatmul.mubr.msk.f32.gmra.mrb[56].mxu1 %vm326_vm0, %v5453_v10  ;;  %4624 = vmatpush3.bf16.msra.mxu0 %v5625_v34 }
 0xc5d   :  { %4071 = vmatprep.mubr.msk.f32.mxu1 %vm326_vm0, %v5456_v11 }
 0xc60   :  { %4072 = vmatmul.mubr.msk.f32.gmra.mrb[58].mxu1 %vm326_vm0, %v5463_v12 }
 0xc61   :  { %4106 = vmatprep.mubr.msk.f32.mxu1 %vm5107_vm4, %v6033_v40 }
 0xd12   :  { %v5868_v60 = vpop.f32.mrb[18].mxu0 }
 0xd13   :  { %v5870_v61 = vpop.f32.mrb[19].mxu0 }
 0xd17   :  { %v4052_v1 = vpop.f32.mrb[44].mxu1 }
 0xd18   :  { %v2289_v2 = vmul.f32 %v4052_v1, %v5477_v17  ;;  %v2209_v4 = vpop.f32.mrb[45].mxu1 }
 0xd19   :  { %v2288_v5 = vmul.f32 %v2209_v4, %v5480_v18 }
 0xd1b   :  { %v5874_v6 = vpack.c.bf16 %v2289_v2, %v2288_v5  ;;  %v4055_v7 = vpop.f32.mrb[46].mxu1 }
 0xd1c   :  { %v2291_v8 = vmul.f32 %v4055_v7, %v5485_v23  ;;  %v2219_v9 = vpop.f32.mrb[47].mxu1 }
 0xd1d   :  { %4548 = vmatpush3.bf16.xpose.msk.msra.mxu1 %vm5489_vm5, %v5874_v6  ;;  %4626 = vmatprep.subr.bf16.mxu0 %v5874_v6  ;;  %v2290_v10 = vmul.f32 %v2219_v9, %v5494_v25 }
 0xd1e   :  { %4549 = vmatprep.subr.bf16.mxu1 %v6038_v59 }
 0xd1f   :  { %v5883_v11 = vpack.c.bf16 %v2291_v8, %v2290_v10  ;;  %v4058_v12 = vpop.f32.mrb[48].mxu1 }
 0xd20   :  { %v2293_v17 = vmul.f32 %v4058_v12, %v5504_v31  ;;  %v2229_v18 = vpop.f32.mrb[49].mxu1 }
 0xd21   :  { %v2292_v22 = vmul.f32 %v2229_v18, %v5508_v32 }
 0xd23   :  { %v5887_v23 = vpack.c.bf16 %v2293_v17, %v2292_v22  ;;  %v4061_v30 = vpop.f32.mrb[50].mxu1 }
 0xd24   :  { %v2295_v3 = vmul.f32 %v4061_v30, %v5513_v38  ;;  %v2239_v36 = vpop.f32.mrb[51].mxu1  ;;  %v2715_v30 = vld [vmem:[#allocation10] sm:$0xff] }
 0xd25   :  { %4552 = vmatpush3.bf16.xpose.msk.msra.mxu1 %vm5489_vm5, %v5883_v11  ;;  %v2294_v25 = vmul.f32 %v2239_v36, %v5516_v39 }
 0xd26   :  { %4553 = vmatprep.subr.bf16.mxu1 %v6038_v59 }
 0xd27   :  { %v5895_v57 = vpack.c.bf16 %v2295_v3, %v2294_v25  ;;  %v4064_v31 = vpop.f32.mrb[52].mxu1  ;;  %v3342_v3 = vld [vmem:[%s6045_s22] ss:$0 sm:$0xff] }
 0xd28   :  { %v2297_v20 = vmul.f32 %v4064_v31, %v5523_v52  ;;  %v2249_v32 = vpop.f32.mrb[53].mxu1 }
 0xd29   :  { %v2296_v33 = vmul.f32 %v2249_v32, %v5527_v53 }
 0xd2b   :  { %v5899_v34 = vpack.c.bf16 %v2297_v20, %v2296_v33  ;;  %v4067_v38 = vpop.f32.mrb[54].mxu1 }
 0xd2c   :  { %v2299_v40 = vmul.f32 %v4067_v38, %v5532_v63  ;;  %v2259_v27 = vpop.f32.mrb[55].mxu1  ;;  %v2890_v38 = vld [vmem:[%s6046_s17 + $0x8] sm:$0xff] }
 0xd2d   :  { %4556 = vmatpush3.bf16.xpose.msk.msra.mxu1 %vm5489_vm5, %v5887_v23  ;;  %v2298_v39 = vmul.f32 %v2259_v27, %v5535_v0  ;;  %v6044_v0 = vld [vmem:[#allocation44_spill] sm:$0xff] }
 0xd2e   :  { %4557 = vmatprep.subr.bf16.mxu1 %v6038_v59  ;;  %v2798_v27 = vld [vmem:[#allocation11] sm:$0xff] }
 0xd2f   :  { %v5907_v21 = vpack.c.bf16 %v2299_v40, %v2298_v39  ;;  %v4070_v52 = vpop.f32.mrb[56].mxu1  ;;  %v2716_v40 = vld [vmem:[#allocation10 + $0x8] sm:$0xff] }
 0xd30   :  { %v2301_v49 = vmul.f32 %v4070_v52, %v6039_v54  ;;  %v2269_v53 = vpop.f32.mrb[57].mxu1  ;;  %v2892_v52 = vld [vmem:[%s6046_s17 + $0x18] sm:$0xff]  ;;  %v2799_v54 = vld [vmem:[#allocation11 + $0x8] sm:$0xff] }
 0xd31   :  { %v2300_v48 = vmul.f32 %v2269_v53, %v6040_v50  ;;  %v2893_v53 = vld [vmem:[%s6046_s17 + $0x20] sm:$0xff]  ;;  %v2894_v50 = vld [vmem:[%s6046_s17 + $0x28] sm:$0xff] }
 0xd33   :  { %v4570_v28 = vpack.c.bf16 %v2301_v49, %v2300_v48  ;;  %v4073_v63 = vpop.f32.mrb[58].mxu1  ;;  %v4673_v48 = vpack.c.bf16 %v2894_v50, %v2893_v53 }
 0xd34   :  { %v2303_v29 = vmul.f32 %v4073_v63, %v6042_v44  ;;  %v2279_v35 = vpop.f32.mrb[59].mxu1  ;;  %v2896_v63 = vld [vmem:[%s6046_s17 + $0x38] sm:$0xff] }
 0xd35   :  { %4560 = vmatpush3.bf16.xpose.msk.msra.mxu1 %vm5489_vm5, %v5895_v57  ;;  %v2302_v47 = vmul.f32 %v2279_v35, %v6044_v0  ;;  %v2882_v35 = vld [vmem:[%s6047_s23 + $0x8] sm:$0xff] }
 0xd36   :  { %4561 = vmatprep.subr.bf16.mxu1 %v6038_v59 }
 0xd37   :  { %v4574_v43 = vpack.c.bf16 %v2303_v29, %v2302_v47  ;;  %v2881_v29 = vld [vmem:[%s6047_s23] sm:$0xff] }
 0xd38   :  { %v4681_v0 = vpack.c.bf16 %v2882_v35, %v2881_v29  ;;  %v3070_v47 = vld [vmem:[%s5258_s27] sm:$0xff] }
 0xd3d   :  { %4564 = vmatpush3.bf16.xpose.msk.msra.mxu1 %vm5489_vm5, %v5899_v34 }
 0xd3e   :  { %4565 = vmatprep.subr.bf16.mxu1 %v6038_v59 }
 0xd45   :  { %4568 = vmatpush3.bf16.xpose.msk.msra.mxu1 %vm5489_vm5, %v5907_v21 }
 0xd46   :  { %4569 = vmatprep.subr.bf16.mxu1 %v6038_v59 }
 0xd4d   :  { %4572 = vmatpush3.bf16.xpose.msk.msra.mxu1 %vm5489_vm5, %v4570_v28 }
 0xd4e   :  { %4573 = vmatprep.subr.bf16.mxu1 %v6038_v59 }
 0xd55   :  { %4576 = vmatpush3.bf16.xpose.msk.msra.mxu1 %vm5489_vm5, %v4574_v43 }
 0xd5c   :  { %4107 = vmatmul.mubr.msk.f32.vlgmr.msra.gmra.mrb[60].mxu1 %vm986_vm3, %v2312_v16 }
 0xd5d   :  { %4202 = vmatprep.mubr.msk.f32.mxu1 %vm326_vm0, %v2715_v30 }
 0xe2f   :  { %v2430_v42 = vpop.f32.mrb[60].mxu1 }
 0xe30   :  { %v2437_v56 = vrot.slane %v2430_v42, %v5599_v51  ;;  %v4108_v55 = vpop.f32.mrb[61].mxu1 }
 0xe31   :  { %v2884_v55 = vld [vmem:[%s6047_s23 + $0x18] sm:$0xff] }
 0xe32   :  { %v2511_v26 = vadd.f32 %v5870_v61, %v2437_v56  ;;  %v2516_v58 = vadd.f32 %v5868_v60, %v2437_v56  ;;  %v2883_v56 = vld [vmem:[%s6047_s23 + $0x10] sm:$0xff] }
 0xe34   :  { %v2528_v59 = vadd.f32 %v2526_v19, %v2511_v26  ;;  %v2529_v37 = vadd.f32 %v2527_v41, %v2516_v58  ;;  %v4685_v26 = vpack.c.bf16 %v2884_v55, %v2883_v56  ;;  %v2885_v58 = vld [vmem:[%s6047_s23 + $0x20] sm:$0xff] }
 0xe36   :  { %vm2531_vm14 = vcmp.gt.f32.partialorder %v2529_v37, 0.0  ;;  %v2533_v24 = vmul.f32 0.2, %v2529_v37  ;;  %vm2530_vm15 = vcmp.gt.f32.partialorder %v2528_v59, 0.0  ;;  %v2532_v13 = vmul.f32 0.2, %v2528_v59 }
 0xe38   :  { %v2535_v1 = vsel %vm2531_vm14, %v2529_v37, %v2533_v24  ;;  %v2534_v2 = vsel %vm2530_vm15, %v2528_v59, %v2532_v13  ;;  %v2886_v59 = vld [vmem:[%s6047_s23 + $0x28] sm:$0xff]  ;;  %v2887_v24 = vld [vmem:[%s6047_s23 + $0x30] sm:$0xff]  ;;  %v2888_v13 = vld [vmem:[%s6047_s23 + $0x38] sm:$0xff] }
 0xe39   :  { %v2537_v51 = vsel %vm1874_vm12, %v2535_v1, -1e+30  ;;  %v2536_v14 = vsel %vm1873_vm13, %v2534_v2, -1e+30  ;;  %v4689_v37 = vpack.c.bf16 %v2886_v59, %v2885_v58  ;;  %v4693_v1 = vpack.c.bf16 %v2888_v13, %v2887_v24  ;;  %v3072_v2 = vld [vmem:[%s5258_s27 + $0x10] sm:$0xff] }
 0xe3a   :  { %2540 = vmax.xlane.f32.xlu1 %v2537_v51  ;;  %2538 = vmax.xlane.f32.xlu0 %v2536_v14 }
 0xec7   :  { %v2541_v15 = vpop.xlane.xlu1 %2540  ;;  %v2539_v61 = vpop.xlane.xlu0 %2538 }
 0xec8   :  { %v2543_v4 = vsub.f32 %v2537_v51, %v2541_v15  ;;  %v2542_v60 = vsub.f32 %v2536_v14, %v2539_v61  ;;  %v3073_v51 = vld [vmem:[%s5258_s27 + $0x18] sm:$0xff]  ;;  %v3351_v15 = vld [vmem:[%s5253_s20] ss:$0 sm:$0xff]  ;;  %s5027_s20 = scalar_lea.vmem %s3171_s0, 256 }
 0xec9   :  { %v4701_v14 = vpack.c.bf16 %v3073_v51, %v3072_v2  ;;  %p5028_p4 = scmp.ne.s32.totalorder %s3171_s0, %s5027_s20  ;;  %p5033_p6 = scmp.lt.s32.totalorder %s5027_s20, %s5027_s20 }
 0xeca   :  { %v2546_v5 = vmul.f32 1.442695, %v2543_v4  ;;  %v2544_v7 = vmul.f32 1.442695, %v2542_v60 }
 0xecb   :  { %p5034_p7 = por %p5033_p6, %p5032_p5 }
 0xecc   :  { %4774 = vpow2.f32 %v2546_v5 }
 0xecd   :  { %4776 = vpow2.f32 %v2544_v7  ;;  %p5035_p8 = pnand %p5034_p7, %p5028_p4 }
 0xed6   :  { %v4775_v8 = vpop.eup %4774 }
 0xed7   :  { %v4777_v9 = vpop.eup %4776  ;;  %v2549_v10 = vmul.f32 %v4775_v8, %v5380_v45 }
 0xed8   :  { %v2548_v12 = vmul.f32 %v4777_v9, %v5382_v46  ;;  %v3352_v9 = vld [vmem:[%s5263_s29] ss:$0 sm:$0xff] }
 0xeda   :  { %4160 = vmatprep.mubr.f32.mxu0 %v2548_v12 }
 0xedb   :  { %4161 = vmatmul.mubr.f32.vlgmr.msra.gmra.mrb[20].mxu0 %v2549_v10 }
 0xedc   :  { %4628 = vmatpush3.bf16.msra.mxu0 %v5874_v6 }
 0xedd   :  { %4630 = vmatprep.subr.bf16.mxu0 %v5883_v11 }
 0xee0   :  { %4632 = vmatpush3.bf16.msra.mxu0 %v5883_v11 }
 0xee1   :  { %4634 = vmatprep.subr.bf16.mxu0 %v5887_v23 }
 0xee4   :  { %4636 = vmatpush3.bf16.msra.mxu0 %v5887_v23 }
 0xee5   :  { %4638 = vmatprep.subr.bf16.mxu0 %v5895_v57 }
 0xee8   :  { %4640 = vmatpush3.bf16.msra.mxu0 %v5895_v57 }
 0xee9   :  { %4642 = vmatprep.subr.bf16.mxu0 %v5899_v34 }
 0xeec   :  { %4644 = vmatpush3.bf16.msra.mxu0 %v5899_v34  ;;  %v2889_v34 = vld [vmem:[%s6046_s17] sm:$0xff] }
 0xeed   :  { %4646 = vmatprep.subr.bf16.mxu0 %v5907_v21  ;;  %v4665_v39 = vpack.c.bf16 %v2890_v38, %v2889_v34 }
 0xef0   :  { %4648 = vmatpush3.bf16.msra.mxu0 %v5907_v21  ;;  %v2891_v21 = vld [vmem:[%s6046_s17 + $0x10] sm:$0xff] }
 0xef1   :  { %4650 = vmatprep.subr.bf16.mxu0 %v4570_v28  ;;  %v4669_v49 = vpack.c.bf16 %v2892_v52, %v2891_v21 }
 0xef4   :  { %4652 = vmatpush3.bf16.msra.mxu0 %v4570_v28  ;;  %v2895_v28 = vld [vmem:[%s6046_s17 + $0x30] sm:$0xff] }
 0xef5   :  { %4654 = vmatprep.subr.bf16.mxu0 %v4574_v43  ;;  %v4677_v44 = vpack.c.bf16 %v2896_v63, %v2895_v28 }
 0xef8   :  { %4656 = vmatpush3.bf16.msra.mxu0 %v4574_v43  ;;  %v3071_v43 = vld [vmem:[%s5258_s27 + $0x8] sm:$0xff] }
 0xef9   :  { %v4697_v16 = vpack.c.bf16 %v3071_v43, %v3070_v47 }
 0xefb   :  { %4698 = vmatprep.subr.bf16.mxu0 %v4697_v16 }
 0xfae   :  { %v4162_v45 = vpop.f32.mrb[20].mxu0 }
 0xfaf   :  { %v2626_v46 = vmax.f32 %v4162_v45, 1e-20  ;;  %v2616_v6 = vpop.f32.mrb[21].mxu0 }
 0xfb0   :  { %v2625_v11 = vmax.f32 %v2616_v6, 1e-20 }
 0xfb1   :  { %4778 = vrcp.f32 %v2626_v46 }
 0xfb2   :  { %4780 = vrcp.f32 %v2625_v11 }
 0xfbb   :  { %v4779_v17 = vpop.eup %4778 }
 0xfbc   :  { %v4781_v18 = vpop.eup %4780  ;;  %v2630_v23 = vmul.f32 %v4779_v17, %v2549_v10 }
 0xfbd   :  { %v2628_v22 = vmul.f32 %v4781_v18, %v2548_v12 }
 0xfbf   :  { %4195 = vmatprep.mubr.f32.mxu0 %v2628_v22 }
 0xfc0   :  { %4196 = vmatmul.mubr.f32.vlgmr.msra.gmra.mrb[22].mxu0 %v2630_v23 }
 0xfc1   :  { %4700 = vmatpush3.bf16.msra.mxu0 %v4697_v16 }
 0xfc2   :  { %4702 = vmatprep.subr.bf16.mxu0 %v4701_v14 }
 0xfc5   :  { %4704 = vmatpush3.bf16.msra.mxu0 %v4701_v14 }
0x1093   :  { %v4197_v36 = vpop.f32.mrb[22].mxu0 }
0x1094   :  { %v2710_v25 = vadd.f32 %v4197_v36, %v3342_v3  ;;  %v2704_v57 = vpop.f32.mrb[23].mxu0 }
0x1095   :  { %v2705_v31 = vadd.f32 %v3342_v3, %v2704_v57 }
0x1096   :  { %v2714_v20 = vmax.f32 %v2710_v25, 0.0 }
0x1097   :  { %v2713_v32 = vmax.f32 %v2705_v31, 0.0 }
0x1099   :  { %v4657_v33 = vpack.c.bf16 %v2714_v20, %v2713_v32 }
0x109b   :  { %4658 = vmatprep.subr.bf16.mxu1 %v4657_v33 }
0x109c   :  { %4660 = vmatpush3.bf16.msra.mxu1 %v4657_v33 }
0x109d   :  { %4662 = vmatprep.subr.bf16.mxu1 %v4657_v33 }
0x109f   :  { %4203 = vmatmul.mubr.msk.f32.vlgmr.msra.gmra.mrb[62].mxu1 %vm326_vm0, %v2716_v40 }
0x10a0   :  { %4664 = vmatpush3.bf16.msra.mxu1 %v4657_v33  ;;  %4209 = vmatprep.mubr.msk.f32.mxu1 %vm326_vm0, %v2798_v27 }
0x10a1   :  { %4666 = vmatprep.subr.bf16.mxu1 %v4665_v39 }
0x10a3   :  { %4210 = vmatmul.mubr.msk.f32.vlgmr.msra.gmra.mrb[64].mxu1 %vm326_vm0, %v2799_v54  ;;  %vm3081_vm0 = vcmask 261120  }
0x10a4   :  { %4668 = vmatpush3.bf16.msra.mxu1 %v4665_v39 }
0x10a5   :  { %4670 = vmatprep.subr.bf16.mxu1 %v4669_v49 }
0x10a8   :  { %4672 = vmatpush3.bf16.msra.mxu1 %v4669_v49 }
0x10a9   :  { %4674 = vmatprep.subr.bf16.mxu1 %v4673_v48 }
0x10ac   :  { %4676 = vmatpush3.bf16.msra.mxu1 %v4673_v48 }
0x10ad   :  { %4678 = vmatprep.subr.bf16.mxu1 %v4677_v44 }
0x10b0   :  { %4680 = vmatpush3.bf16.msra.mxu1 %v4677_v44 }
0x10b1   :  { %4682 = vmatprep.subr.bf16.mxu1 %v4681_v0 }
0x1172   :  { %v4204_v62 = vpop.f32.mrb[62].mxu1 }
0x1173   :  { %v2789_v42 = vpop.f32.mrb[63].mxu1 }
0x1176   :  { %v4211_v41 = vpop.f32.mrb[64].mxu1 }
0x1177   :  { %v2872_v19 = vpop.f32.mrb[65].mxu1 }
0x1178   :  { %4228 = vmatprep.mubr.msk.f32.mxu1 %vm986_vm3, %v2872_v19 }
0x1179   :  { %4229 = vmatmul.mubr.msk.f32.vlgmr.msra.gmra.mrb[66].mxu1 %vm986_vm3, %v4211_v41 }
0x117a   :  { %4684 = vmatpush3.bf16.msra.mxu1 %v4681_v0  ;;  %4247 = vmatprep.mubr.msk.f32.mxu1 %vm986_vm3, %v2789_v42 }
0x117b   :  { %4686 = vmatprep.subr.bf16.mxu1 %v4685_v26 }
0x117e   :  { %4688 = vmatpush3.bf16.msra.mxu1 %v4685_v26 }
0x117f   :  { %4690 = vmatprep.subr.bf16.mxu1 %v4689_v37 }
0x1182   :  { %4692 = vmatpush3.bf16.msra.mxu1 %v4689_v37 }
0x1183   :  { %4694 = vmatprep.subr.bf16.mxu1 %v4693_v1 }
0x1186   :  { %4696 = vmatpush3.bf16.msra.mxu1 %v4693_v1 }
0x1189   :  { %4248 = vmatmul.mubr.msk.f32.vlgmr.msra.gmra.mrb[66].mxu1 %vm986_vm3, %v4204_v62 }
0x125c   :  { %v4249_v61 = vpop.f32.mrb[66].mxu1 }
0x125d   :  { %v3067_v4 = vadd.f32 %v4249_v61, %v3351_v15  ;;  %v3050_v60 = vpop.f32.mrb[67].mxu1 }
0x125e   :  { %v3066_v5 = vadd.f32 %v3351_v15, %v3050_v60 }
0x125f   :  { %v3069_v8 = vmax.f32 %v3067_v4, 0.0 }
0x1260   :  { %v3068_v7 = vmax.f32 %v3066_v5, 0.0 }
0x1262   :  { %4258 = vmatprep.mubr.msk.f32.mxu0 %vm3081_vm0, %v3068_v7 }
0x1263   :  { %4259 = vmatmul.mubr.msk.f32.vlgmr.msra.gmra.mrb[24].mxu0 %vm3081_vm0, %v3069_v8 }
0x1336   :  { %v4260_v10 = vpop.f32.mrb[24].mxu0 }
0x1337   :  { %v3160_v12 = vadd.f32 %v4260_v10, %v3352_v9  ;;  %v3154_v45 = vpop.f32.mrb[25].mxu0 }
0x1338   :  { %v3155_v46 = vadd.f32 %v3352_v9, %v3154_v45 }
0x1339   :  { %3164 = vst [vmem:[#allocation20 + $0x8] sm:$0xff] %v3160_v12 }
0x133a   :  { %3163 = vst [vmem:[#allocation20] sm:$0xff] %v3155_v46 }
0x133b   :  { %5038 = shalt.err (!%p5035_p8)
}
0x133c   :  { %s5039_s29 = scalar_lea.hbm %s5268_s3, 256 }
0x133d   :  { %p5040_p9 = scmp.ne.s32.totalorder %s5268_s3, %s5039_s29  ;;  %p5043_p10 = scmp.lt.u32.totalorder %s5039_s29, %s5268_s3 }
0x133f   :  { %p5045_p11 = pnand %p5043_p10, %p5040_p9 }
0x1341   :  { %5048 = shalt.err (!%p5045_p11)
}
0x1342   :  { %3176 = dma.vmem_to_hbm [thread:$0]  %s3171_s0, 256, %s5268_s3, [#allocation4], %s5095_s26, %s5095_s26, %s5096_s28  }
0x1343   :  { %5061 = dma.done.wait [#allocation4], 256  }
0x1344   :  { %5062 = vsyncadd [#allocation4], 4294967040 }
0x1345   :  { %3180 = vsyncpa [#allocation3], 1 }
0x1346   :  { %3181 = vsyncpa [#allocation6], 1 }
0x1347   :  { %3182 = vsyncpa [#allocation9], 1 }
0x1348   :  { %3183 = vsyncpa [#allocation12], 1 }
0x1349   :  { %3184 = vsyncpa [#allocation15], 1 }
0x134a   :  { %3185 = vsyncpa [#allocation18], 1 }
0x134b   :  { %3186 = vsyncpa [#allocation4], 1 }

</bundles_post_ra>
